<compile_context>
chip_gen: v7x
topology: tpu7x:2x2x1
jax: 0.10.0
libtpu: 0.0.40
codegen_flags: <defaults>
</compile_context>

<pallas_src>
import functools

import jax
import jax.numpy as jnp
from jax.experimental import pallas as pl
from jax.experimental.pallas import tpu as pltpu


# ------------------------------ fused kernel --------------------------------

def _decoder_kernel(
    # per-batch activations (block = one batch element)
    tgt_ref, memk_ref, memv_ref, qpos_ref,
    # per-layer weights (block = one layer slice; matmul weights are bf16)
    sa_wqkv_ref, sa_bqkv_ref, sa_wo_ref, sa_bo_ref,
    ca_wqkv_ref, ca_bqkv_ref, ca_wo_ref, ca_bo_ref,
    w1_ref, b1_ref, w2_ref, b2_ref,
    n1_w_ref, n1_b_ref, n2_w_ref, n2_b_ref, n3_w_ref, n3_b_ref,
    # final decoder norm (layer-invariant)
    nf_w_ref, nf_b_ref,
    # output
    out_ref,
    # scratch: residual stream carried across layers (per batch element)
    state_ref,
    *, num_heads, eps):
  D = tgt_ref.shape[-1]
  dh = D // num_heads
  layer = pl.program_id(1)

  @pl.when(layer == 0)
  def _init():
    state_ref[...] = tgt_ref[0]

  def layer_norm(x, g_ref, b_ref):
    g = g_ref[0]                                   # (1, D)
    b = b_ref[0]                                   # (1, D)
    mu = jnp.mean(x, axis=-1, keepdims=True)
    xc = x - mu
    var = jnp.mean(xc * xc, axis=-1, keepdims=True)
    return xc * jax.lax.rsqrt(var + eps) * g + b

  def split_heads(x2):
    # (L, D) -> (H, L, dh) bf16.  One lane slice per head + leading-dim stack
    # (pure data movement, bounded live ranges); all matmuls stay head-batched.
    return jnp.stack(
        [x2[:, h * dh:(h + 1) * dh] for h in range(num_heads)], axis=0
    ).astype(jnp.bfloat16)

  def merge_heads(o):
    # (H, L, dh) f32 -> (L, D)
    return jnp.concatenate([o[h] for h in range(num_heads)], axis=-1)

  def attend(q, k, v):
    """q (lq, D) pre-scaled, k/v (lk, D): head-batched softmax attention."""
    qh, kh, vh = split_heads(q), split_heads(k), split_heads(v)
    s = jnp.einsum('hqd,hkd->hqk', qh, kh, preferred_element_type=jnp.float32)
    s = s - jnp.max(s, axis=-1, keepdims=True)
    p = jnp.exp(s)
    p = p * pl.reciprocal(jnp.sum(p, axis=-1, keepdims=True), approx=True)
    o = jnp.einsum('hqk,hkd->hqd', p.astype(jnp.bfloat16), vh,
                   preferred_element_type=jnp.float32)
    return merge_heads(o)

  x = state_ref[...]                               # (T, D) f32 residual stream
  qpos = qpos_ref[0]                               # (T, D) f32

  # ---- self attention (q = k = x + query_pos, v = x); QK projection fused ---
  wqkv = sa_wqkv_ref[0]                            # (D, 3D) bf16, Q pre-scaled
  bqkv = sa_bqkv_ref[0]                            # (1, 3D) f32
  q_in = (x + qpos).astype(jnp.bfloat16)
  qk = jnp.dot(q_in, wqkv[:, :2 * D],
               preferred_element_type=jnp.float32) + bqkv[:, :2 * D]
  v = jnp.dot(x.astype(jnp.bfloat16), wqkv[:, 2 * D:],
              preferred_element_type=jnp.float32) + bqkv[:, 2 * D:]
  sa = attend(qk[:, :D], qk[:, D:], v)
  sa = jnp.dot(sa.astype(jnp.bfloat16), sa_wo_ref[0],
               preferred_element_type=jnp.float32) + sa_bo_ref[0]
  x = layer_norm(x + sa, n1_w_ref, n1_b_ref)

  # ---- cross attention (q = x + query_pos, k = memory + pos, v = memory) ----
  wqkv = ca_wqkv_ref[0]
  bqkv = ca_bqkv_ref[0]
  q = jnp.dot((x + qpos).astype(jnp.bfloat16), wqkv[:, :D],
              preferred_element_type=jnp.float32) + bqkv[:, :D]
  k = jnp.dot(memk_ref[0], wqkv[:, D:2 * D],
              preferred_element_type=jnp.float32) + bqkv[:, D:2 * D]
  v = jnp.dot(memv_ref[0], wqkv[:, 2 * D:],
              preferred_element_type=jnp.float32) + bqkv[:, 2 * D:]
  ca = attend(q, k, v)
  ca = jnp.dot(ca.astype(jnp.bfloat16), ca_wo_ref[0],
               preferred_element_type=jnp.float32) + ca_bo_ref[0]
  x = layer_norm(x + ca, n2_w_ref, n2_b_ref)

  # ---- feed-forward ----
  hid = jnp.dot(x.astype(jnp.bfloat16), w1_ref[0],
                preferred_element_type=jnp.float32) + b1_ref[0]
  hid = jnp.maximum(hid, 0.0)
  hid = jnp.dot(hid.astype(jnp.bfloat16), w2_ref[0],
                preferred_element_type=jnp.float32) + b2_ref[0]
  x = layer_norm(x + hid, n3_w_ref, n3_b_ref)

  state_ref[...] = x
  # Written every layer; only the last write before this batch's output block
  # index changes is flushed to HBM, so the final-norm result is what lands.
  out_ref[0] = layer_norm(x, nf_w_ref, nf_b_ref).astype(out_ref.dtype)


# ------------------------------ wrapper --------------------------------------

def transformer_decoder(tgt, memory, packed, pos, query_pos, *, num_heads, eps=1e-5):
  """TransformerDecoder.forward (return_intermediate=False, no masks)."""
  T, B, D = tgt.shape
  S = memory.shape[0]
  L = packed["sa_wqkv"].shape[0]
  FF = packed["w1"].shape[-1]
  assert D % num_heads == 0

  # One-time layout plumbing: (seq, B, D) -> (B, seq, D).  memory K/V inputs
  # are layer-invariant and only feed bf16 matmuls -> store them bf16.
  tgt_b = jnp.transpose(tgt, (1, 0, 2))
  qpos_b = jnp.transpose(query_pos, (1, 0, 2))
  memk_b = jnp.transpose(memory + pos, (1, 0, 2)).astype(jnp.bfloat16)
  memv_b = jnp.transpose(memory, (1, 0, 2)).astype(jnp.bfloat16)

  kernel = functools.partial(_decoder_kernel, num_heads=num_heads, eps=eps)

  def act_spec(rows):           # per-batch activation block
    return pl.BlockSpec((1, rows, D), lambda b, l: (b, 0, 0))

  def layer_spec(*tail):        # per-layer stacked weight block
    return pl.BlockSpec((1,) + tail, lambda b, l: (l, 0, 0))

  def const_spec(*tail):        # layer-invariant 3-D tensor
    return pl.BlockSpec((1,) + tail, lambda b, l: (0, 0, 0))

  in_specs = [
      act_spec(T), act_spec(S), act_spec(S), act_spec(T),
      layer_spec(D, 3 * D), layer_spec(1, 3 * D), layer_spec(D, D), layer_spec(1, D),
      layer_spec(D, 3 * D), layer_spec(1, 3 * D), layer_spec(D, D), layer_spec(1, D),
      layer_spec(D, FF), layer_spec(1, FF), layer_spec(FF, D), layer_spec(1, D),
      layer_spec(1, D), layer_spec(1, D), layer_spec(1, D), layer_spec(1, D),
      layer_spec(1, D), layer_spec(1, D),
      const_spec(1, D), const_spec(1, D),
  ]

  weight_args = (
      packed["sa_wqkv"], packed["sa_bqkv"], packed["sa_wo"], packed["sa_bo"],
      packed["ca_wqkv"], packed["ca_bqkv"], packed["ca_wo"], packed["ca_bo"],
      packed["w1"], packed["b1"], packed["w2"], packed["b2"],
      packed["n1_w"], packed["n1_b"], packed["n2_w"], packed["n2_b"],
      packed["n3_w"], packed["n3_b"],
      packed["nf_w"], packed["nf_b"])

  # VMEM budget: ~double-buffered per-step blocks + headroom for intermediates.
  per_step = sum(int(a.nbytes) // int(a.shape[0]) for a in weight_args)
  per_step += sum(int(a.nbytes) // B for a in (tgt_b, qpos_b, memk_b, memv_b))
  per_step += T * D * 4
  vmem_limit = int(min(96 * 2**20, max(16 * 2**20, 4 * per_step + (8 << 20))))

  out = pl.pallas_call(
      kernel,
      out_shape=jax.ShapeDtypeStruct((B, T, D), jnp.float32),
      grid=(B, L),
      in_specs=in_specs,
      out_specs=pl.BlockSpec((1, T, D), lambda b, l: (b, 0, 0)),
      scratch_shapes=[pltpu.VMEM((T, D), jnp.float32)],
      compiler_params=pltpu.CompilerParams(
          dimension_semantics=("parallel", "arbitrary"),
          vmem_limit_bytes=vmem_limit),
  )(tgt_b, memk_b, memv_b, qpos_b, *weight_args)

  return jnp.transpose(out, (1, 0, 2))


# ------------------------- param init / packing ------------------------------

def init_mha_params(key, d_model):
  k1, k2 = jax.random.split(key)
  s = 0.02
  return {
      "in_proj_weight": s * jax.random.normal(k1, (3 * d_model, d_model), jnp.float32),
      "in_proj_bias": jnp.zeros((3 * d_model,), jnp.float32),
      "out_proj_weight": s * jax.random.normal(k2, (d_model, d_model), jnp.float32),
      "out_proj_bias": jnp.zeros((d_model,), jnp.float32),
  }


def init_layer_params(key, d_model, dim_ff):
  keys = jax.random.split(key, 4)
  s = 0.02
  return {
      "self_attn": init_mha_params(keys[0], d_model),
      "cross_attn": init_mha_params(keys[1], d_model),
      "linear1_w": s * jax.random.normal(keys[2], (dim_ff, d_model), jnp.float32),
      "linear1_b": jnp.zeros((dim_ff,), jnp.float32),
      "linear2_w": s * jax.random.normal(keys[3], (d_model, dim_ff), jnp.float32),
      "linear2_b": jnp.zeros((d_model,), jnp.float32),
      "norm1_w": jnp.ones((d_model,), jnp.float32),
      "norm1_b": jnp.zeros((d_model,), jnp.float32),
      "norm2_w": jnp.ones((d_model,), jnp.float32),
      "norm2_b": jnp.zeros((d_model,), jnp.float32),
      "norm3_w": jnp.ones((d_model,), jnp.float32),
      "norm3_b": jnp.zeros((d_model,), jnp.float32),
  }


def init_decoder_params(key, num_layers, d_model, dim_ff):
  keys = jax.random.split(key, num_layers)
  return {
      "layers": [init_layer_params(k, d_model, dim_ff) for k in keys],
      "norm_w": jnp.ones((d_model,), jnp.float32),
      "norm_b": jnp.zeros((d_model,), jnp.float32),
  }


def pack_decoder_params(params, num_heads):
  """One-time pack: stack per-layer weights, pre-transpose to (K, N), fold the
  1/sqrt(dh) attention scale into the Q projection, and store matmul weights
  as bf16 (MXU-native, halves weight DMA)."""
  layers = params["layers"]
  D = params["norm_w"].shape[0]
  scale = 1.0 / float(D // num_heads) ** 0.5

  def stack(fn):
    return jnp.stack([fn(lp) for lp in layers], axis=0)

  def qkv_w(p):
    w = p["in_proj_weight"].T                      # (D, 3D)
    return jnp.concatenate([w[:, :D] * scale, w[:, D:]], axis=-1)

  def qkv_b(p):
    b = p["in_proj_bias"]
    return jnp.concatenate([b[:D] * scale, b[D:]]).reshape(1, -1)

  return {
      "sa_wqkv": stack(lambda p: qkv_w(p["self_attn"])).astype(jnp.bfloat16),
      "sa_bqkv": stack(lambda p: qkv_b(p["self_attn"])),
      "sa_wo": stack(lambda p: p["self_attn"]["out_proj_weight"].T).astype(jnp.bfloat16),
      "sa_bo": stack(lambda p: p["self_attn"]["out_proj_bias"].reshape(1, -1)),
      "ca_wqkv": stack(lambda p: qkv_w(p["cross_attn"])).astype(jnp.bfloat16),
      "ca_bqkv": stack(lambda p: qkv_b(p["cross_attn"])),
      "ca_wo": stack(lambda p: p["cross_attn"]["out_proj_weight"].T).astype(jnp.bfloat16),
      "ca_bo": stack(lambda p: p["cross_attn"]["out_proj_bias"].reshape(1, -1)),
      "w1": stack(lambda p: p["linear1_w"].T).astype(jnp.bfloat16),
      "b1": stack(lambda p: p["linear1_b"].reshape(1, -1)),
      "w2": stack(lambda p: p["linear2_w"].T).astype(jnp.bfloat16),
      "b2": stack(lambda p: p["linear2_b"].reshape(1, -1)),
      "n1_w": stack(lambda p: p["norm1_w"].reshape(1, -1)),
      "n1_b": stack(lambda p: p["norm1_b"].reshape(1, -1)),
      "n2_w": stack(lambda p: p["norm2_w"].reshape(1, -1)),
      "n2_b": stack(lambda p: p["norm2_b"].reshape(1, -1)),
      "n3_w": stack(lambda p: p["norm3_w"].reshape(1, -1)),
      "n3_b": stack(lambda p: p["norm3_b"].reshape(1, -1)),
      "nf_w": params["norm_w"].reshape(1, 1, D),
      "nf_b": params["norm_b"].reshape(1, 1, D),
  }


# --------------------------- pure-JAX reference -------------------------------

_HP = jax.lax.Precision.HIGHEST


def _ref_ln(x, g, b, eps=1e-5):
  mu = x.mean(-1, keepdims=True)
  var = ((x - mu) ** 2).mean(-1, keepdims=True)
  return (x - mu) * jax.lax.rsqrt(var + eps) * g + b


def _ref_mha(query, key, value, p, num_heads):
  Tq, B, D = query.shape
  Tk = key.shape[0]
  dh = D // num_heads
  wq, wk, wv = jnp.split(p["in_proj_weight"], 3, axis=0)
  bq, bk, bv = jnp.split(p["in_proj_bias"], 3)
  q = jnp.einsum("tbd,ed->tbe", query, wq, precision=_HP) + bq
  k = jnp.einsum("tbd,ed->tbe", key, wk, precision=_HP) + bk
  v = jnp.einsum("tbd,ed->tbe", value, wv, precision=_HP) + bv
  q = q.reshape(Tq, B * num_heads, dh).transpose(1, 0, 2) * (1.0 / float(dh) ** 0.5)
  k = k.reshape(Tk, B * num_heads, dh).transpose(1, 0, 2)
  v = v.reshape(Tk, B * num_heads, dh).transpose(1, 0, 2)
  s = jnp.einsum("bqd,bkd->bqk", q, k, precision=_HP)
  a = jax.nn.softmax(s, axis=-1)
  o = jnp.einsum("bqk,bkd->bqd", a, v, precision=_HP)
  o = o.transpose(1, 0, 2).reshape(Tq, B, D)
  return jnp.einsum("tbd,ed->tbe", o, p["out_proj_weight"], precision=_HP) + p["out_proj_bias"]


def _ref_decoder(tgt, memory, params, pos, query_pos, num_heads):
  out = tgt
  for p in params["layers"]:
    q = out + query_pos
    t2 = _ref_mha(q, q, out, p["self_attn"], num_heads)
    out = _ref_ln(out + t2, p["norm1_w"], p["norm1_b"])
    t2 = _ref_mha(out + query_pos, memory + pos, memory, p["cross_attn"], num_heads)
    out = _ref_ln(out + t2, p["norm2_w"], p["norm2_b"])
    h = jax.nn.relu(jnp.einsum("tbd,fd->tbf", out, p["linear1_w"], precision=_HP)
                    + p["linear1_b"])
    h = jnp.einsum("tbf,df->tbd", h, p["linear2_w"], precision=_HP) + p["linear2_b"]
    out = _ref_ln(out + h, p["norm3_w"], p["norm3_b"])
  return _ref_ln(out, params["norm_w"], params["norm_b"])


# --------------------------------- main ---------------------------------------

if __name__ == "__main__":
  D_MODEL = 32
  NUM_HEADS = 4
  DIM_FF = 64
  NUM_LAYERS = 2
  T_TGT = 8      # number of decoder queries
  S_MEM = 16     # memory sequence length
  BATCH = 2

  root = jax.random.PRNGKey(0)
  k_p, k_tgt, k_mem, k_pos, k_qpos = jax.random.split(root, 5)

  params = init_decoder_params(k_p, NUM_LAYERS, D_MODEL, DIM_FF)
  packed = pack_decoder_params(params, NUM_HEADS)   # stack + pre-transpose + bf16

  tgt = jax.random.normal(k_tgt, (T_TGT, BATCH, D_MODEL), jnp.float32)
  memory = jax.random.normal(k_mem, (S_MEM, BATCH, D_MODEL), jnp.float32)
  pos = jax.random.normal(k_pos, (S_MEM, BATCH, D_MODEL), jnp.float32)
  query_pos = jax.random.normal(k_qpos, (T_TGT, BATCH, D_MODEL), jnp.float32)

  fwd = jax.jit(functools.partial(transformer_decoder, num_heads=NUM_HEADS))
  out = fwd(tgt, memory, packed, pos, query_pos)
  jax.block_until_ready(out)

  ref = _ref_decoder(tgt, memory, params, pos, query_pos, NUM_HEADS)

  assert out.shape == (T_TGT, BATCH, D_MODEL), out.shape
  assert jnp.all(jnp.isfinite(out))
  max_err = float(jnp.max(jnp.abs(out - ref)))
  # bf16 matmul operands (f32 accumulation) -> slightly looser tolerance.
  assert jnp.allclose(out, ref, atol=2e-2, rtol=2e-2), f"max abs err {max_err}"
  print("KERNEL_OK")
</pallas_src>

<mosaic_0001>
module attributes {stable_mosaic.version = 11 : i64} {
  func.func @_decoder_kernel(%arg0: i32, %arg1: i32, %arg2: memref<1x8x32xf32, #tpu.memory_space<vmem>>, %arg3: memref<1x16x32xbf16, #tpu.memory_space<vmem>>, %arg4: memref<1x16x32xbf16, #tpu.memory_space<vmem>>, %arg5: memref<1x8x32xf32, #tpu.memory_space<vmem>>, %arg6: memref<1x32x96xbf16, #tpu.memory_space<vmem>>, %arg7: memref<1x1x96xf32, #tpu.memory_space<vmem>>, %arg8: memref<1x32x32xbf16, #tpu.memory_space<vmem>>, %arg9: memref<1x1x32xf32, #tpu.memory_space<vmem>>, %arg10: memref<1x32x96xbf16, #tpu.memory_space<vmem>>, %arg11: memref<1x1x96xf32, #tpu.memory_space<vmem>>, %arg12: memref<1x32x32xbf16, #tpu.memory_space<vmem>>, %arg13: memref<1x1x32xf32, #tpu.memory_space<vmem>>, %arg14: memref<1x32x64xbf16, #tpu.memory_space<vmem>>, %arg15: memref<1x1x64xf32, #tpu.memory_space<vmem>>, %arg16: memref<1x64x32xbf16, #tpu.memory_space<vmem>>, %arg17: memref<1x1x32xf32, #tpu.memory_space<vmem>>, %arg18: memref<1x1x32xf32, #tpu.memory_space<vmem>>, %arg19: memref<1x1x32xf32, #tpu.memory_space<vmem>>, %arg20: memref<1x1x32xf32, #tpu.memory_space<vmem>>, %arg21: memref<1x1x32xf32, #tpu.memory_space<vmem>>, %arg22: memref<1x1x32xf32, #tpu.memory_space<vmem>>, %arg23: memref<1x1x32xf32, #tpu.memory_space<vmem>>, %arg24: memref<1x1x32xf32, #tpu.memory_space<vmem>>, %arg25: memref<1x1x32xf32, #tpu.memory_space<vmem>>, %arg26: memref<1x8x32xf32, #tpu.memory_space<vmem>>, %arg27: memref<8x32xf32, #tpu.memory_space<vmem>>) attributes {dimension_semantics = [#tpu.dimension_semantics<parallel>, #tpu.dimension_semantics<arbitrary>], iteration_bounds = array<i64: 2, 2>, scalar_prefetch = 0 : i64, scratch_operands = 1 : i64, tpu.core_type = #tpu.core_type<tc>, window_params = [{transform_indices = @transform_0, window_bounds = array<i64: 1, 8, 32>}, {transform_indices = @transform_1, window_bounds = array<i64: 1, 16, 32>}, {transform_indices = @transform_2, window_bounds = array<i64: 1, 16, 32>}, {transform_indices = @transform_3, window_bounds = array<i64: 1, 8, 32>}, {transform_indices = @transform_4, window_bounds = array<i64: 1, 32, 96>}, {transform_indices = @transform_5, window_bounds = array<i64: 1, 1, 96>}, {transform_indices = @transform_6, window_bounds = array<i64: 1, 32, 32>}, {transform_indices = @transform_7, window_bounds = array<i64: 1, 1, 32>}, {transform_indices = @transform_8, window_bounds = array<i64: 1, 32, 96>}, {transform_indices = @transform_9, window_bounds = array<i64: 1, 1, 96>}, {transform_indices = @transform_10, window_bounds = array<i64: 1, 32, 32>}, {transform_indices = @transform_11, window_bounds = array<i64: 1, 1, 32>}, {transform_indices = @transform_12, window_bounds = array<i64: 1, 32, 64>}, {transform_indices = @transform_13, window_bounds = array<i64: 1, 1, 64>}, {transform_indices = @transform_14, window_bounds = array<i64: 1, 64, 32>}, {transform_indices = @transform_15, window_bounds = array<i64: 1, 1, 32>}, {transform_indices = @transform_16, window_bounds = array<i64: 1, 1, 32>}, {transform_indices = @transform_17, window_bounds = array<i64: 1, 1, 32>}, {transform_indices = @transform_18, window_bounds = array<i64: 1, 1, 32>}, {transform_indices = @transform_19, window_bounds = array<i64: 1, 1, 32>}, {transform_indices = @transform_20, window_bounds = array<i64: 1, 1, 32>}, {transform_indices = @transform_21, window_bounds = array<i64: 1, 1, 32>}, {pipeline_mode = #tpu.pipeline_mode<synchronous>, transform_indices = @transform_22, window_bounds = array<i64: 1, 1, 32>}, {pipeline_mode = #tpu.pipeline_mode<synchronous>, transform_indices = @transform_23, window_bounds = array<i64: 1, 1, 32>}, {transform_indices = @transform_24, window_bounds = array<i64: 1, 8, 32>}]} {
    %c0_i32 = arith.constant 0 : i32
    %0 = arith.cmpi eq, %arg1, %c0_i32 : i32
    %1 = arith.extui %0 : i1 to i32
    %c0_i32_0 = arith.constant 0 : i32
    %2 = arith.cmpi ne, %1, %c0_i32_0 : i32
    scf.if %2 {
      %c0_113 = arith.constant 0 : index
      %c0_114 = arith.constant 0 : index
      %c0_115 = arith.constant 0 : index
      %291 = vector.load %arg2[%c0_113, %c0_114, %c0_115] : memref<1x8x32xf32, #tpu.memory_space<vmem>>, vector<1x8x32xf32>
      %292 = vector.shape_cast %291 : vector<1x8x32xf32> to vector<8x32xf32>
      %c0_116 = arith.constant 0 : index
      %c0_117 = arith.constant 0 : index
      %293 = vector.load %arg27[%c0_116, %c0_117] : memref<8x32xf32, #tpu.memory_space<vmem>>, vector<8x32xf32>
      tpu.vector_store %arg27[%c0_116, %c0_117], %292 {strides = array<i32>} : memref<8x32xf32, #tpu.memory_space<vmem>>, vector<8x32xf32>,
    } else {
    }
    %c0 = arith.constant 0 : index
    %c0_1 = arith.constant 0 : index
    %3 = vector.load %arg27[%c0, %c0_1] : memref<8x32xf32, #tpu.memory_space<vmem>>, vector<8x32xf32>
    %c0_2 = arith.constant 0 : index
    %c0_3 = arith.constant 0 : index
    %c0_4 = arith.constant 0 : index
    %4 = vector.load %arg5[%c0_2, %c0_3, %c0_4] : memref<1x8x32xf32, #tpu.memory_space<vmem>>, vector<1x8x32xf32>
    %5 = vector.shape_cast %4 : vector<1x8x32xf32> to vector<8x32xf32>
    %c0_5 = arith.constant 0 : index
    %c0_6 = arith.constant 0 : index
    %c0_7 = arith.constant 0 : index
    %6 = vector.load %arg6[%c0_5, %c0_6, %c0_7] : memref<1x32x96xbf16, #tpu.memory_space<vmem>>, vector<1x32x96xbf16>
    %7 = vector.shape_cast %6 : vector<1x32x96xbf16> to vector<32x96xbf16>
    %c0_8 = arith.constant 0 : index
    %c0_9 = arith.constant 0 : index
    %c0_10 = arith.constant 0 : index
    %8 = vector.load %arg7[%c0_8, %c0_9, %c0_10] : memref<1x1x96xf32, #tpu.memory_space<vmem>>, vector<1x1x96xf32>
    %9 = vector.shape_cast %8 : vector<1x1x96xf32> to vector<1x96xf32>
    %10 = arith.addf %3, %5 : vector<8x32xf32>
    %11 = arith.truncf %10 : vector<8x32xf32> to vector<8x32xbf16>
    %12 = vector.extract_strided_slice %7 {offsets = [0, 0], sizes = [32, 64], strides = [1, 1]} : vector<32x96xbf16> to vector<32x64xbf16>
    %cst = arith.constant dense<0.000000e+00> : vector<8x64xf32>
    %13 = tpu.matmul %11, %12, %cst {dimension_numbers = #tpu.dot_dimension_numbers<[1], [0], [0], [1], [0, 0, 1, 1], [], []>} : vector<8x32xbf16>, vector<32x64xbf16>, vector<8x64xf32> -> vector<8x64xf32>
    %14 = vector.extract_strided_slice %9 {offsets = [0, 0], sizes = [1, 64], strides = [1, 1]} : vector<1x96xf32> to vector<1x64xf32>
    %15 = vector.broadcast %14 : vector<1x64xf32> to vector<8x64xf32>
    %16 = arith.addf %13, %15 : vector<8x64xf32>
    %17 = arith.truncf %3 : vector<8x32xf32> to vector<8x32xbf16>
    %18 = vector.extract_strided_slice %7 {offsets = [0, 64], sizes = [32, 32], strides = [1, 1]} : vector<32x96xbf16> to vector<32x32xbf16>
    %cst_11 = arith.constant dense<0.000000e+00> : vector<8x32xf32>
    %19 = tpu.matmul %17, %18, %cst_11 {dimension_numbers = #tpu.dot_dimension_numbers<[1], [0], [0], [1], [0, 0, 1, 1], [], []>} : vector<8x32xbf16>, vector<32x32xbf16>, vector<8x32xf32> -> vector<8x32xf32>
    %20 = vector.extract_strided_slice %9 {offsets = [0, 64], sizes = [1, 32], strides = [1, 1]} : vector<1x96xf32> to vector<1x32xf32>
    %21 = vector.broadcast %20 : vector<1x32xf32> to vector<8x32xf32>
    %22 = arith.addf %19, %21 : vector<8x32xf32>
    %23 = vector.extract_strided_slice %16 {offsets = [0, 0], sizes = [8, 32], strides = [1, 1]} : vector<8x64xf32> to vector<8x32xf32>
    %24 = vector.extract_strided_slice %16 {offsets = [0, 32], sizes = [8, 32], strides = [1, 1]} : vector<8x64xf32> to vector<8x32xf32>
    %25 = vector.extract_strided_slice %23 {offsets = [0, 0], sizes = [8, 8], strides = [1, 1]} : vector<8x32xf32> to vector<8x8xf32>
    %26 = vector.extract_strided_slice %23 {offsets = [0, 8], sizes = [8, 8], strides = [1, 1]} : vector<8x32xf32> to vector<8x8xf32>
    %27 = vector.extract_strided_slice %23 {offsets = [0, 16], sizes = [8, 8], strides = [1, 1]} : vector<8x32xf32> to vector<8x8xf32>
    %28 = vector.extract_strided_slice %23 {offsets = [0, 24], sizes = [8, 8], strides = [1, 1]} : vector<8x32xf32> to vector<8x8xf32>
    %29 = vector.shape_cast %25 : vector<8x8xf32> to vector<1x8x8xf32>
    %30 = vector.shape_cast %26 : vector<8x8xf32> to vector<1x8x8xf32>
    %31 = vector.shape_cast %27 : vector<8x8xf32> to vector<1x8x8xf32>
    %32 = vector.shape_cast %28 : vector<8x8xf32> to vector<1x8x8xf32>
    %33 = tpu.concatenate %29, %30, %31, %32 in 0 : vector<1x8x8xf32>, vector<1x8x8xf32>, vector<1x8x8xf32>, vector<1x8x8xf32> -> vector<4x8x8xf32>
    %34 = arith.truncf %33 : vector<4x8x8xf32> to vector<4x8x8xbf16>
    %35 = vector.extract_strided_slice %24 {offsets = [0, 0], sizes = [8, 8], strides = [1, 1]} : vector<8x32xf32> to vector<8x8xf32>
    %36 = vector.extract_strided_slice %24 {offsets = [0, 8], sizes = [8, 8], strides = [1, 1]} : vector<8x32xf32> to vector<8x8xf32>
    %37 = vector.extract_strided_slice %24 {offsets = [0, 16], sizes = [8, 8], strides = [1, 1]} : vector<8x32xf32> to vector<8x8xf32>
    %38 = vector.extract_strided_slice %24 {offsets = [0, 24], sizes = [8, 8], strides = [1, 1]} : vector<8x32xf32> to vector<8x8xf32>
    %39 = vector.shape_cast %35 : vector<8x8xf32> to vector<1x8x8xf32>
    %40 = vector.shape_cast %36 : vector<8x8xf32> to vector<1x8x8xf32>
    %41 = vector.shape_cast %37 : vector<8x8xf32> to vector<1x8x8xf32>
    %42 = vector.shape_cast %38 : vector<8x8xf32> to vector<1x8x8xf32>
    %43 = tpu.concatenate %39, %40, %41, %42 in 0 : vector<1x8x8xf32>, vector<1x8x8xf32>, vector<1x8x8xf32>, vector<1x8x8xf32> -> vector<4x8x8xf32>
    %44 = arith.truncf %43 : vector<4x8x8xf32> to vector<4x8x8xbf16>
    %45 = vector.extract_strided_slice %22 {offsets = [0, 0], sizes = [8, 8], strides = [1, 1]} : vector<8x32xf32> to vector<8x8xf32>
    %46 = vector.extract_strided_slice %22 {offsets = [0, 8], sizes = [8, 8], strides = [1, 1]} : vector<8x32xf32> to vector<8x8xf32>
    %47 = vector.extract_strided_slice %22 {offsets = [0, 16], sizes = [8, 8], strides = [1, 1]} : vector<8x32xf32> to vector<8x8xf32>
    %48 = vector.extract_strided_slice %22 {offsets = [0, 24], sizes = [8, 8], strides = [1, 1]} : vector<8x32xf32> to vector<8x8xf32>
    %49 = vector.shape_cast %45 : vector<8x8xf32> to vector<1x8x8xf32>
    %50 = vector.shape_cast %46 : vector<8x8xf32> to vector<1x8x8xf32>
    %51 = vector.shape_cast %47 : vector<8x8xf32> to vector<1x8x8xf32>
    %52 = vector.shape_cast %48 : vector<8x8xf32> to vector<1x8x8xf32>
    %53 = tpu.concatenate %49, %50, %51, %52 in 0 : vector<1x8x8xf32>, vector<1x8x8xf32>, vector<1x8x8xf32>, vector<1x8x8xf32> -> vector<4x8x8xf32>
    %54 = arith.truncf %53 : vector<4x8x8xf32> to vector<4x8x8xbf16>
    "tpu.trace_start"() <{level = 10 : i32, message = "hqd,hkd->hqk"}> : () -> ()
    %cst_12 = arith.constant dense<0.000000e+00> : vector<4x8x8xf32>
    %55 = tpu.matmul %34, %44, %cst_12 {dimension_numbers = #tpu.dot_dimension_numbers<[2], [2], [1], [1], [0, 0, 0, 1, 1, 1], [0], [0]>} : vector<4x8x8xbf16>, vector<4x8x8xbf16>, vector<4x8x8xf32> -> vector<4x8x8xf32>
    "tpu.trace_stop"() : () -> ()
    %cst_13 = arith.constant dense<0xFF800000> : vector<4x8xf32>
    %56 = vector.multi_reduction <maximumf>, %55, %cst_13 [2] : vector<4x8x8xf32> to vector<4x8xf32>
    %57 = vector.shape_cast %56 : vector<4x8xf32> to vector<4x8x1xf32>
    %58 = vector.broadcast %57 : vector<4x8x1xf32> to vector<4x8x8xf32>
    %59 = arith.subf %55, %58 : vector<4x8x8xf32>
    %60 = math.exp %59 : vector<4x8x8xf32>
    %cst_14 = arith.constant dense<0.000000e+00> : vector<4x8xf32>
    %61 = vector.multi_reduction <add>, %60, %cst_14 [2] : vector<4x8x8xf32> to vector<4x8xf32>
    %62 = vector.shape_cast %61 : vector<4x8xf32> to vector<4x8x1xf32>
    %63 = tpu.reciprocal %62 {approx = true} : vector<4x8x1xf32> -> vector<4x8x1xf32>
    %64 = vector.broadcast %63 : vector<4x8x1xf32> to vector<4x8x8xf32>
    %65 = arith.mulf %60, %64 : vector<4x8x8xf32>
    %66 = arith.truncf %65 : vector<4x8x8xf32> to vector<4x8x8xbf16>
    "tpu.trace_start"() <{level = 10 : i32, message = "hqk,hkd->hqd"}> : () -> ()
    %cst_15 = arith.constant dense<0.000000e+00> : vector<4x8x8xf32>
    %67 = tpu.matmul %66, %54, %cst_15 {dimension_numbers = #tpu.dot_dimension_numbers<[2], [1], [1], [2], [0, 0, 0, 1, 1, 2], [0], [0]>} : vector<4x8x8xbf16>, vector<4x8x8xbf16>, vector<4x8x8xf32> -> vector<4x8x8xf32>
    "tpu.trace_stop"() : () -> ()
    %68 = vector.extract_strided_slice %67 {offsets = [0, 0, 0], sizes = [1, 8, 8], strides = [1, 1, 1]} : vector<4x8x8xf32> to vector<1x8x8xf32>
    %69 = vector.shape_cast %68 : vector<1x8x8xf32> to vector<8x8xf32>
    %70 = vector.extract_strided_slice %67 {offsets = [1, 0, 0], sizes = [1, 8, 8], strides = [1, 1, 1]} : vector<4x8x8xf32> to vector<1x8x8xf32>
    %71 = vector.shape_cast %70 : vector<1x8x8xf32> to vector<8x8xf32>
    %72 = vector.extract_strided_slice %67 {offsets = [2, 0, 0], sizes = [1, 8, 8], strides = [1, 1, 1]} : vector<4x8x8xf32> to vector<1x8x8xf32>
    %73 = vector.shape_cast %72 : vector<1x8x8xf32> to vector<8x8xf32>
    %74 = vector.extract_strided_slice %67 {offsets = [3, 0, 0], sizes = [1, 8, 8], strides = [1, 1, 1]} : vector<4x8x8xf32> to vector<1x8x8xf32>
    %75 = vector.shape_cast %74 : vector<1x8x8xf32> to vector<8x8xf32>
    %76 = tpu.concatenate %69, %71, %73, %75 in 1 : vector<8x8xf32>, vector<8x8xf32>, vector<8x8xf32>, vector<8x8xf32> -> vector<8x32xf32>
    %77 = arith.truncf %76 : vector<8x32xf32> to vector<8x32xbf16>
    %c0_16 = arith.constant 0 : index
    %c0_17 = arith.constant 0 : index
    %c0_18 = arith.constant 0 : index
    %78 = vector.load %arg8[%c0_16, %c0_17, %c0_18] : memref<1x32x32xbf16, #tpu.memory_space<vmem>>, vector<1x32x32xbf16>
    %79 = vector.shape_cast %78 : vector<1x32x32xbf16> to vector<32x32xbf16>
    %cst_19 = arith.constant dense<0.000000e+00> : vector<8x32xf32>
    %80 = tpu.matmul %77, %79, %cst_19 {dimension_numbers = #tpu.dot_dimension_numbers<[1], [0], [0], [1], [0, 0, 1, 1], [], []>} : vector<8x32xbf16>, vector<32x32xbf16>, vector<8x32xf32> -> vector<8x32xf32>
    %c0_20 = arith.constant 0 : index
    %c0_21 = arith.constant 0 : index
    %c0_22 = arith.constant 0 : index
    %81 = vector.load %arg9[%c0_20, %c0_21, %c0_22] : memref<1x1x32xf32, #tpu.memory_space<vmem>>, vector<1x1x32xf32>
    %82 = vector.shape_cast %81 : vector<1x1x32xf32> to vector<1x32xf32>
    %83 = vector.broadcast %82 : vector<1x32xf32> to vector<8x32xf32>
    %84 = arith.addf %80, %83 : vector<8x32xf32>
    %85 = arith.addf %3, %84 : vector<8x32xf32>
    %c0_23 = arith.constant 0 : index
    %c0_24 = arith.constant 0 : index
    %c0_25 = arith.constant 0 : index
    %86 = vector.load %arg18[%c0_23, %c0_24, %c0_25] : memref<1x1x32xf32, #tpu.memory_space<vmem>>, vector<1x1x32xf32>
    %87 = vector.shape_cast %86 : vector<1x1x32xf32> to vector<1x32xf32>
    %c0_26 = arith.constant 0 : index
    %c0_27 = arith.constant 0 : index
    %c0_28 = arith.constant 0 : index
    %88 = vector.load %arg19[%c0_26, %c0_27, %c0_28] : memref<1x1x32xf32, #tpu.memory_space<vmem>>, vector<1x1x32xf32>
    %89 = vector.shape_cast %88 : vector<1x1x32xf32> to vector<1x32xf32>
    %cst_29 = arith.constant dense<0.000000e+00> : vector<8xf32>
    %90 = vector.multi_reduction <add>, %85, %cst_29 [1] : vector<8x32xf32> to vector<8xf32>
    %91 = vector.shape_cast %90 : vector<8xf32> to vector<8x1xf32>
    %cst_30 = arith.constant 3.200000e+01 : f32
    %92 = vector.broadcast %cst_30 : f32 to vector<8x1xf32>
    %93 = arith.divf %91, %92 : vector<8x1xf32>
    %94 = vector.broadcast %93 : vector<8x1xf32> to vector<8x32xf32>
    %95 = arith.subf %85, %94 : vector<8x32xf32>
    %96 = arith.mulf %95, %95 : vector<8x32xf32>
    %cst_31 = arith.constant dense<0.000000e+00> : vector<8xf32>
    %97 = vector.multi_reduction <add>, %96, %cst_31 [1] : vector<8x32xf32> to vector<8xf32>
    %98 = vector.shape_cast %97 : vector<8xf32> to vector<8x1xf32>
    %cst_32 = arith.constant 3.200000e+01 : f32
    %99 = vector.broadcast %cst_32 : f32 to vector<8x1xf32>
    %100 = arith.divf %98, %99 : vector<8x1xf32>
    %cst_33 = arith.constant 9.99999974E-6 : f32
    %101 = vector.broadcast %cst_33 : f32 to vector<8x1xf32>
    %102 = arith.addf %100, %101 : vector<8x1xf32>
    %103 = math.rsqrt %102 : vector<8x1xf32>
    %104 = vector.broadcast %103 : vector<8x1xf32> to vector<8x32xf32>
    %105 = arith.mulf %95, %104 : vector<8x32xf32>
    %106 = vector.broadcast %87 : vector<1x32xf32> to vector<8x32xf32>
    %107 = arith.mulf %105, %106 : vector<8x32xf32>
    %108 = vector.broadcast %89 : vector<1x32xf32> to vector<8x32xf32>
    %109 = arith.addf %107, %108 : vector<8x32xf32>
    %c0_34 = arith.constant 0 : index
    %c0_35 = arith.constant 0 : index
    %c0_36 = arith.constant 0 : index
    %110 = vector.load %arg10[%c0_34, %c0_35, %c0_36] : memref<1x32x96xbf16, #tpu.memory_space<vmem>>, vector<1x32x96xbf16>
    %111 = vector.shape_cast %110 : vector<1x32x96xbf16> to vector<32x96xbf16>
    %c0_37 = arith.constant 0 : index
    %c0_38 = arith.constant 0 : index
    %c0_39 = arith.constant 0 : index
    %112 = vector.load %arg11[%c0_37, %c0_38, %c0_39] : memref<1x1x96xf32, #tpu.memory_space<vmem>>, vector<1x1x96xf32>
    %113 = vector.shape_cast %112 : vector<1x1x96xf32> to vector<1x96xf32>
    %114 = arith.addf %109, %5 : vector<8x32xf32>
    %115 = arith.truncf %114 : vector<8x32xf32> to vector<8x32xbf16>
    %116 = vector.extract_strided_slice %111 {offsets = [0, 0], sizes = [32, 32], strides = [1, 1]} : vector<32x96xbf16> to vector<32x32xbf16>
    %cst_40 = arith.constant dense<0.000000e+00> : vector<8x32xf32>
    %117 = tpu.matmul %115, %116, %cst_40 {dimension_numbers = #tpu.dot_dimension_numbers<[1], [0], [0], [1], [0, 0, 1, 1], [], []>} : vector<8x32xbf16>, vector<32x32xbf16>, vector<8x32xf32> -> vector<8x32xf32>
    %118 = vector.extract_strided_slice %113 {offsets = [0, 0], sizes = [1, 32], strides = [1, 1]} : vector<1x96xf32> to vector<1x32xf32>
    %119 = vector.broadcast %118 : vector<1x32xf32> to vector<8x32xf32>
    %120 = arith.addf %117, %119 : vector<8x32xf32>
    %c0_41 = arith.constant 0 : index
    %c0_42 = arith.constant 0 : index
    %c0_43 = arith.constant 0 : index
    %121 = vector.load %arg3[%c0_41, %c0_42, %c0_43] : memref<1x16x32xbf16, #tpu.memory_space<vmem>>, vector<1x16x32xbf16>
    %122 = vector.shape_cast %121 : vector<1x16x32xbf16> to vector<16x32xbf16>
    %123 = vector.extract_strided_slice %111 {offsets = [0, 32], sizes = [32, 32], strides = [1, 1]} : vector<32x96xbf16> to vector<32x32xbf16>
    %cst_44 = arith.constant dense<0.000000e+00> : vector<16x32xf32>
    %124 = tpu.matmul %122, %123, %cst_44 {dimension_numbers = #tpu.dot_dimension_numbers<[1], [0], [0], [1], [0, 0, 1, 1], [], []>} : vector<16x32xbf16>, vector<32x32xbf16>, vector<16x32xf32> -> vector<16x32xf32>
    %125 = vector.extract_strided_slice %113 {offsets = [0, 32], sizes = [1, 32], strides = [1, 1]} : vector<1x96xf32> to vector<1x32xf32>
    %126 = vector.broadcast %125 : vector<1x32xf32> to vector<16x32xf32>
    %127 = arith.addf %124, %126 : vector<16x32xf32>
    %c0_45 = arith.constant 0 : index
    %c0_46 = arith.constant 0 : index
    %c0_47 = arith.constant 0 : index
    %128 = vector.load %arg4[%c0_45, %c0_46, %c0_47] : memref<1x16x32xbf16, #tpu.memory_space<vmem>>, vector<1x16x32xbf16>
    %129 = vector.shape_cast %128 : vector<1x16x32xbf16> to vector<16x32xbf16>
    %130 = vector.extract_strided_slice %111 {offsets = [0, 64], sizes = [32, 32], strides = [1, 1]} : vector<32x96xbf16> to vector<32x32xbf16>
    %cst_48 = arith.constant dense<0.000000e+00> : vector<16x32xf32>
    %131 = tpu.matmul %129, %130, %cst_48 {dimension_numbers = #tpu.dot_dimension_numbers<[1], [0], [0], [1], [0, 0, 1, 1], [], []>} : vector<16x32xbf16>, vector<32x32xbf16>, vector<16x32xf32> -> vector<16x32xf32>
    %132 = vector.extract_strided_slice %113 {offsets = [0, 64], sizes = [1, 32], strides = [1, 1]} : vector<1x96xf32> to vector<1x32xf32>
    %133 = vector.broadcast %132 : vector<1x32xf32> to vector<16x32xf32>
    %134 = arith.addf %131, %133 : vector<16x32xf32>
    %135 = vector.extract_strided_slice %120 {offsets = [0, 0], sizes = [8, 8], strides = [1, 1]} : vector<8x32xf32> to vector<8x8xf32>
    %136 = vector.extract_strided_slice %120 {offsets = [0, 8], sizes = [8, 8], strides = [1, 1]} : vector<8x32xf32> to vector<8x8xf32>
    %137 = vector.extract_strided_slice %120 {offsets = [0, 16], sizes = [8, 8], strides = [1, 1]} : vector<8x32xf32> to vector<8x8xf32>
    %138 = vector.extract_strided_slice %120 {offsets = [0, 24], sizes = [8, 8], strides = [1, 1]} : vector<8x32xf32> to vector<8x8xf32>
    %139 = vector.shape_cast %135 : vector<8x8xf32> to vector<1x8x8xf32>
    %140 = vector.shape_cast %136 : vector<8x8xf32> to vector<1x8x8xf32>
    %141 = vector.shape_cast %137 : vector<8x8xf32> to vector<1x8x8xf32>
    %142 = vector.shape_cast %138 : vector<8x8xf32> to vector<1x8x8xf32>
    %143 = tpu.concatenate %139, %140, %141, %142 in 0 : vector<1x8x8xf32>, vector<1x8x8xf32>, vector<1x8x8xf32>, vector<1x8x8xf32> -> vector<4x8x8xf32>
    %144 = arith.truncf %143 : vector<4x8x8xf32> to vector<4x8x8xbf16>
    %145 = vector.extract_strided_slice %127 {offsets = [0, 0], sizes = [16, 8], strides = [1, 1]} : vector<16x32xf32> to vector<16x8xf32>
    %146 = vector.extract_strided_slice %127 {offsets = [0, 8], sizes = [16, 8], strides = [1, 1]} : vector<16x32xf32> to vector<16x8xf32>
    %147 = vector.extract_strided_slice %127 {offsets = [0, 16], sizes = [16, 8], strides = [1, 1]} : vector<16x32xf32> to vector<16x8xf32>
    %148 = vector.extract_strided_slice %127 {offsets = [0, 24], sizes = [16, 8], strides = [1, 1]} : vector<16x32xf32> to vector<16x8xf32>
    %149 = vector.shape_cast %145 : vector<16x8xf32> to vector<1x16x8xf32>
    %150 = vector.shape_cast %146 : vector<16x8xf32> to vector<1x16x8xf32>
    %151 = vector.shape_cast %147 : vector<16x8xf32> to vector<1x16x8xf32>
    %152 = vector.shape_cast %148 : vector<16x8xf32> to vector<1x16x8xf32>
    %153 = tpu.concatenate %149, %150, %151, %152 in 0 : vector<1x16x8xf32>, vector<1x16x8xf32>, vector<1x16x8xf32>, vector<1x16x8xf32> -> vector<4x16x8xf32>
    %154 = arith.truncf %153 : vector<4x16x8xf32> to vector<4x16x8xbf16>
    %155 = vector.extract_strided_slice %134 {offsets = [0, 0], sizes = [16, 8], strides = [1, 1]} : vector<16x32xf32> to vector<16x8xf32>
    %156 = vector.extract_strided_slice %134 {offsets = [0, 8], sizes = [16, 8], strides = [1, 1]} : vector<16x32xf32> to vector<16x8xf32>
    %157 = vector.extract_strided_slice %134 {offsets = [0, 16], sizes = [16, 8], strides = [1, 1]} : vector<16x32xf32> to vector<16x8xf32>
    %158 = vector.extract_strided_slice %134 {offsets = [0, 24], sizes = [16, 8], strides = [1, 1]} : vector<16x32xf32> to vector<16x8xf32>
    %159 = vector.shape_cast %155 : vector<16x8xf32> to vector<1x16x8xf32>
    %160 = vector.shape_cast %156 : vector<16x8xf32> to vector<1x16x8xf32>
    %161 = vector.shape_cast %157 : vector<16x8xf32> to vector<1x16x8xf32>
    %162 = vector.shape_cast %158 : vector<16x8xf32> to vector<1x16x8xf32>
    %163 = tpu.concatenate %159, %160, %161, %162 in 0 : vector<1x16x8xf32>, vector<1x16x8xf32>, vector<1x16x8xf32>, vector<1x16x8xf32> -> vector<4x16x8xf32>
    %164 = arith.truncf %163 : vector<4x16x8xf32> to vector<4x16x8xbf16>
    "tpu.trace_start"() <{level = 10 : i32, message = "hqd,hkd->hqk"}> : () -> ()
    %cst_49 = arith.constant dense<0.000000e+00> : vector<4x8x16xf32>
    %165 = tpu.matmul %144, %154, %cst_49 {dimension_numbers = #tpu.dot_dimension_numbers<[2], [2], [1], [1], [0, 0, 0, 1, 1, 1], [0], [0]>} : vector<4x8x8xbf16>, vector<4x16x8xbf16>, vector<4x8x16xf32> -> vector<4x8x16xf32>
    "tpu.trace_stop"() : () -> ()
    %cst_50 = arith.constant dense<0xFF800000> : vector<4x8xf32>
    %166 = vector.multi_reduction <maximumf>, %165, %cst_50 [2] : vector<4x8x16xf32> to vector<4x8xf32>
    %167 = vector.shape_cast %166 : vector<4x8xf32> to vector<4x8x1xf32>
    %168 = vector.broadcast %167 : vector<4x8x1xf32> to vector<4x8x16xf32>
    %169 = arith.subf %165, %168 : vector<4x8x16xf32>
    %170 = math.exp %169 : vector<4x8x16xf32>
    %cst_51 = arith.constant dense<0.000000e+00> : vector<4x8xf32>
    %171 = vector.multi_reduction <add>, %170, %cst_51 [2] : vector<4x8x16xf32> to vector<4x8xf32>
    %172 = vector.shape_cast %171 : vector<4x8xf32> to vector<4x8x1xf32>
    %173 = tpu.reciprocal %172 {approx = true} : vector<4x8x1xf32> -> vector<4x8x1xf32>
    %174 = vector.broadcast %173 : vector<4x8x1xf32> to vector<4x8x16xf32>
    %175 = arith.mulf %170, %174 : vector<4x8x16xf32>
    %176 = arith.truncf %175 : vector<4x8x16xf32> to vector<4x8x16xbf16>
    "tpu.trace_start"() <{level = 10 : i32, message = "hqk,hkd->hqd"}> : () -> ()
    %cst_52 = arith.constant dense<0.000000e+00> : vector<4x8x8xf32>
    %177 = tpu.matmul %176, %164, %cst_52 {dimension_numbers = #tpu.dot_dimension_numbers<[2], [1], [1], [2], [0, 0, 0, 1, 1, 2], [0], [0]>} : vector<4x8x16xbf16>, vector<4x16x8xbf16>, vector<4x8x8xf32> -> vector<4x8x8xf32>
    "tpu.trace_stop"() : () -> ()
    %178 = vector.extract_strided_slice %177 {offsets = [0, 0, 0], sizes = [1, 8, 8], strides = [1, 1, 1]} : vector<4x8x8xf32> to vector<1x8x8xf32>
    %179 = vector.shape_cast %178 : vector<1x8x8xf32> to vector<8x8xf32>
    %180 = vector.extract_strided_slice %177 {offsets = [1, 0, 0], sizes = [1, 8, 8], strides = [1, 1, 1]} : vector<4x8x8xf32> to vector<1x8x8xf32>
    %181 = vector.shape_cast %180 : vector<1x8x8xf32> to vector<8x8xf32>
    %182 = vector.extract_strided_slice %177 {offsets = [2, 0, 0], sizes = [1, 8, 8], strides = [1, 1, 1]} : vector<4x8x8xf32> to vector<1x8x8xf32>
    %183 = vector.shape_cast %182 : vector<1x8x8xf32> to vector<8x8xf32>
    %184 = vector.extract_strided_slice %177 {offsets = [3, 0, 0], sizes = [1, 8, 8], strides = [1, 1, 1]} : vector<4x8x8xf32> to vector<1x8x8xf32>
    %185 = vector.shape_cast %184 : vector<1x8x8xf32> to vector<8x8xf32>
    %186 = tpu.concatenate %179, %181, %183, %185 in 1 : vector<8x8xf32>, vector<8x8xf32>, vector<8x8xf32>, vector<8x8xf32> -> vector<8x32xf32>
    %187 = arith.truncf %186 : vector<8x32xf32> to vector<8x32xbf16>
    %c0_53 = arith.constant 0 : index
    %c0_54 = arith.constant 0 : index
    %c0_55 = arith.constant 0 : index
    %188 = vector.load %arg12[%c0_53, %c0_54, %c0_55] : memref<1x32x32xbf16, #tpu.memory_space<vmem>>, vector<1x32x32xbf16>
    %189 = vector.shape_cast %188 : vector<1x32x32xbf16> to vector<32x32xbf16>
    %cst_56 = arith.constant dense<0.000000e+00> : vector<8x32xf32>
    %190 = tpu.matmul %187, %189, %cst_56 {dimension_numbers = #tpu.dot_dimension_numbers<[1], [0], [0], [1], [0, 0, 1, 1], [], []>} : vector<8x32xbf16>, vector<32x32xbf16>, vector<8x32xf32> -> vector<8x32xf32>
    %c0_57 = arith.constant 0 : index
    %c0_58 = arith.constant 0 : index
    %c0_59 = arith.constant 0 : index
    %191 = vector.load %arg13[%c0_57, %c0_58, %c0_59] : memref<1x1x32xf32, #tpu.memory_space<vmem>>, vector<1x1x32xf32>
    %192 = vector.shape_cast %191 : vector<1x1x32xf32> to vector<1x32xf32>
    %193 = vector.broadcast %192 : vector<1x32xf32> to vector<8x32xf32>
    %194 = arith.addf %190, %193 : vector<8x32xf32>
    %195 = arith.addf %109, %194 : vector<8x32xf32>
    %c0_60 = arith.constant 0 : index
    %c0_61 = arith.constant 0 : index
    %c0_62 = arith.constant 0 : index
    %196 = vector.load %arg20[%c0_60, %c0_61, %c0_62] : memref<1x1x32xf32, #tpu.memory_space<vmem>>, vector<1x1x32xf32>
    %197 = vector.shape_cast %196 : vector<1x1x32xf32> to vector<1x32xf32>
    %c0_63 = arith.constant 0 : index
    %c0_64 = arith.constant 0 : index
    %c0_65 = arith.constant 0 : index
    %198 = vector.load %arg21[%c0_63, %c0_64, %c0_65] : memref<1x1x32xf32, #tpu.memory_space<vmem>>, vector<1x1x32xf32>
    %199 = vector.shape_cast %198 : vector<1x1x32xf32> to vector<1x32xf32>
    %cst_66 = arith.constant dense<0.000000e+00> : vector<8xf32>
    %200 = vector.multi_reduction <add>, %195, %cst_66 [1] : vector<8x32xf32> to vector<8xf32>
    %201 = vector.shape_cast %200 : vector<8xf32> to vector<8x1xf32>
    %cst_67 = arith.constant 3.200000e+01 : f32
    %202 = vector.broadcast %cst_67 : f32 to vector<8x1xf32>
    %203 = arith.divf %201, %202 : vector<8x1xf32>
    %204 = vector.broadcast %203 : vector<8x1xf32> to vector<8x32xf32>
    %205 = arith.subf %195, %204 : vector<8x32xf32>
    %206 = arith.mulf %205, %205 : vector<8x32xf32>
    %cst_68 = arith.constant dense<0.000000e+00> : vector<8xf32>
    %207 = vector.multi_reduction <add>, %206, %cst_68 [1] : vector<8x32xf32> to vector<8xf32>
    %208 = vector.shape_cast %207 : vector<8xf32> to vector<8x1xf32>
    %cst_69 = arith.constant 3.200000e+01 : f32
    %209 = vector.broadcast %cst_69 : f32 to vector<8x1xf32>
    %210 = arith.divf %208, %209 : vector<8x1xf32>
    %cst_70 = arith.constant 9.99999974E-6 : f32
    %211 = vector.broadcast %cst_70 : f32 to vector<8x1xf32>
    %212 = arith.addf %210, %211 : vector<8x1xf32>
    %213 = math.rsqrt %212 : vector<8x1xf32>
    %214 = vector.broadcast %213 : vector<8x1xf32> to vector<8x32xf32>
    %215 = arith.mulf %205, %214 : vector<8x32xf32>
    %216 = vector.broadcast %197 : vector<1x32xf32> to vector<8x32xf32>
    %217 = arith.mulf %215, %216 : vector<8x32xf32>
    %218 = vector.broadcast %199 : vector<1x32xf32> to vector<8x32xf32>
    %219 = arith.addf %217, %218 : vector<8x32xf32>
    %220 = arith.truncf %219 : vector<8x32xf32> to vector<8x32xbf16>
    %c0_71 = arith.constant 0 : index
    %c0_72 = arith.constant 0 : index
    %c0_73 = arith.constant 0 : index
    %221 = vector.load %arg14[%c0_71, %c0_72, %c0_73] : memref<1x32x64xbf16, #tpu.memory_space<vmem>>, vector<1x32x64xbf16>
    %222 = vector.shape_cast %221 : vector<1x32x64xbf16> to vector<32x64xbf16>
    %cst_74 = arith.constant dense<0.000000e+00> : vector<8x64xf32>
    %223 = tpu.matmul %220, %222, %cst_74 {dimension_numbers = #tpu.dot_dimension_numbers<[1], [0], [0], [1], [0, 0, 1, 1], [], []>} : vector<8x32xbf16>, vector<32x64xbf16>, vector<8x64xf32> -> vector<8x64xf32>
    %c0_75 = arith.constant 0 : index
    %c0_76 = arith.constant 0 : index
    %c0_77 = arith.constant 0 : index
    %224 = vector.load %arg15[%c0_75, %c0_76, %c0_77] : memref<1x1x64xf32, #tpu.memory_space<vmem>>, vector<1x1x64xf32>
    %225 = vector.shape_cast %224 : vector<1x1x64xf32> to vector<1x64xf32>
    %226 = vector.broadcast %225 : vector<1x64xf32> to vector<8x64xf32>
    %227 = arith.addf %223, %226 : vector<8x64xf32>
    %cst_78 = arith.constant 0.000000e+00 : f32
    %228 = vector.broadcast %cst_78 : f32 to vector<8x64xf32>
    %229 = arith.maximumf %227, %228 : vector<8x64xf32>
    %230 = arith.truncf %229 : vector<8x64xf32> to vector<8x64xbf16>
    %c0_79 = arith.constant 0 : index
    %c0_80 = arith.constant 0 : index
    %c0_81 = arith.constant 0 : index
    %231 = vector.load %arg16[%c0_79, %c0_80, %c0_81] : memref<1x64x32xbf16, #tpu.memory_space<vmem>>, vector<1x64x32xbf16>
    %232 = vector.shape_cast %231 : vector<1x64x32xbf16> to vector<64x32xbf16>
    %cst_82 = arith.constant dense<0.000000e+00> : vector<8x32xf32>
    %233 = tpu.matmul %230, %232, %cst_82 {dimension_numbers = #tpu.dot_dimension_numbers<[1], [0], [0], [1], [0, 0, 1, 1], [], []>} : vector<8x64xbf16>, vector<64x32xbf16>, vector<8x32xf32> -> vector<8x32xf32>
    %c0_83 = arith.constant 0 : index
    %c0_84 = arith.constant 0 : index
    %c0_85 = arith.constant 0 : index
    %234 = vector.load %arg17[%c0_83, %c0_84, %c0_85] : memref<1x1x32xf32, #tpu.memory_space<vmem>>, vector<1x1x32xf32>
    %235 = vector.shape_cast %234 : vector<1x1x32xf32> to vector<1x32xf32>
    %236 = vector.broadcast %235 : vector<1x32xf32> to vector<8x32xf32>
    %237 = arith.addf %233, %236 : vector<8x32xf32>
    %238 = arith.addf %219, %237 : vector<8x32xf32>
    %c0_86 = arith.constant 0 : index
    %c0_87 = arith.constant 0 : index
    %c0_88 = arith.constant 0 : index
    %239 = vector.load %arg22[%c0_86, %c0_87, %c0_88] : memref<1x1x32xf32, #tpu.memory_space<vmem>>, vector<1x1x32xf32>
    %240 = vector.shape_cast %239 : vector<1x1x32xf32> to vector<1x32xf32>
    %c0_89 = arith.constant 0 : index
    %c0_90 = arith.constant 0 : index
    %c0_91 = arith.constant 0 : index
    %241 = vector.load %arg23[%c0_89, %c0_90, %c0_91] : memref<1x1x32xf32, #tpu.memory_space<vmem>>, vector<1x1x32xf32>
    %242 = vector.shape_cast %241 : vector<1x1x32xf32> to vector<1x32xf32>
    %cst_92 = arith.constant dense<0.000000e+00> : vector<8xf32>
    %243 = vector.multi_reduction <add>, %238, %cst_92 [1] : vector<8x32xf32> to vector<8xf32>
    %244 = vector.shape_cast %243 : vector<8xf32> to vector<8x1xf32>
    %cst_93 = arith.constant 3.200000e+01 : f32
    %245 = vector.broadcast %cst_93 : f32 to vector<8x1xf32>
    %246 = arith.divf %244, %245 : vector<8x1xf32>
    %247 = vector.broadcast %246 : vector<8x1xf32> to vector<8x32xf32>
    %248 = arith.subf %238, %247 : vector<8x32xf32>
    %249 = arith.mulf %248, %248 : vector<8x32xf32>
    %cst_94 = arith.constant dense<0.000000e+00> : vector<8xf32>
    %250 = vector.multi_reduction <add>, %249, %cst_94 [1] : vector<8x32xf32> to vector<8xf32>
    %251 = vector.shape_cast %250 : vector<8xf32> to vector<8x1xf32>
    %cst_95 = arith.constant 3.200000e+01 : f32
    %252 = vector.broadcast %cst_95 : f32 to vector<8x1xf32>
    %253 = arith.divf %251, %252 : vector<8x1xf32>
    %cst_96 = arith.constant 9.99999974E-6 : f32
    %254 = vector.broadcast %cst_96 : f32 to vector<8x1xf32>
    %255 = arith.addf %253, %254 : vector<8x1xf32>
    %256 = math.rsqrt %255 : vector<8x1xf32>
    %257 = vector.broadcast %256 : vector<8x1xf32> to vector<8x32xf32>
    %258 = arith.mulf %248, %257 : vector<8x32xf32>
    %259 = vector.broadcast %240 : vector<1x32xf32> to vector<8x32xf32>
    %260 = arith.mulf %258, %259 : vector<8x32xf32>
    %261 = vector.broadcast %242 : vector<1x32xf32> to vector<8x32xf32>
    %262 = arith.addf %260, %261 : vector<8x32xf32>
    %c0_97 = arith.constant 0 : index
    %c0_98 = arith.constant 0 : index
    %263 = vector.load %arg27[%c0_97, %c0_98] : memref<8x32xf32, #tpu.memory_space<vmem>>, vector<8x32xf32>
    tpu.vector_store %arg27[%c0_97, %c0_98], %262 {strides = array<i32>} : memref<8x32xf32, #tpu.memory_space<vmem>>, vector<8x32xf32>,
    %c0_99 = arith.constant 0 : index
    %c0_100 = arith.constant 0 : index
    %c0_101 = arith.constant 0 : index
    %264 = vector.load %arg24[%c0_99, %c0_100, %c0_101] : memref<1x1x32xf32, #tpu.memory_space<vmem>>, vector<1x1x32xf32>
    %265 = vector.shape_cast %264 : vector<1x1x32xf32> to vector<1x32xf32>
    %c0_102 = arith.constant 0 : index
    %c0_103 = arith.constant 0 : index
    %c0_104 = arith.constant 0 : index
    %266 = vector.load %arg25[%c0_102, %c0_103, %c0_104] : memref<1x1x32xf32, #tpu.memory_space<vmem>>, vector<1x1x32xf32>
    %267 = vector.shape_cast %266 : vector<1x1x32xf32> to vector<1x32xf32>
    %cst_105 = arith.constant dense<0.000000e+00> : vector<8xf32>
    %268 = vector.multi_reduction <add>, %262, %cst_105 [1] : vector<8x32xf32> to vector<8xf32>
    %269 = vector.shape_cast %268 : vector<8xf32> to vector<8x1xf32>
    %cst_106 = arith.constant 3.200000e+01 : f32
    %270 = vector.broadcast %cst_106 : f32 to vector<8x1xf32>
    %271 = arith.divf %269, %270 : vector<8x1xf32>
    %272 = vector.broadcast %271 : vector<8x1xf32> to vector<8x32xf32>
    %273 = arith.subf %262, %272 : vector<8x32xf32>
    %274 = arith.mulf %273, %273 : vector<8x32xf32>
    %cst_107 = arith.constant dense<0.000000e+00> : vector<8xf32>
    %275 = vector.multi_reduction <add>, %274, %cst_107 [1] : vector<8x32xf32> to vector<8xf32>
    %276 = vector.shape_cast %275 : vector<8xf32> to vector<8x1xf32>
    %cst_108 = arith.constant 3.200000e+01 : f32
    %277 = vector.broadcast %cst_108 : f32 to vector<8x1xf32>
    %278 = arith.divf %276, %277 : vector<8x1xf32>
    %cst_109 = arith.constant 9.99999974E-6 : f32
    %279 = vector.broadcast %cst_109 : f32 to vector<8x1xf32>
    %280 = arith.addf %278, %279 : vector<8x1xf32>
    %281 = math.rsqrt %280 : vector<8x1xf32>
    %282 = vector.broadcast %281 : vector<8x1xf32> to vector<8x32xf32>
    %283 = arith.mulf %273, %282 : vector<8x32xf32>
    %284 = vector.broadcast %265 : vector<1x32xf32> to vector<8x32xf32>
    %285 = arith.mulf %283, %284 : vector<8x32xf32>
    %286 = vector.broadcast %267 : vector<1x32xf32> to vector<8x32xf32>
    %287 = arith.addf %285, %286 : vector<8x32xf32>
    %c0_110 = arith.constant 0 : index
    %c0_111 = arith.constant 0 : index
    %c0_112 = arith.constant 0 : index
    %288 = vector.load %arg26[%c0_110, %c0_111, %c0_112] : memref<1x8x32xf32, #tpu.memory_space<vmem>>, vector<1x8x32xf32>
    %289 = vector.shape_cast %288 : vector<1x8x32xf32> to vector<8x32xf32>
    %290 = vector.shape_cast %287 : vector<8x32xf32> to vector<1x8x32xf32>
    tpu.vector_store %arg26[%c0_110, %c0_111, %c0_112], %290 {strides = array<i32>} : memref<1x8x32xf32, #tpu.memory_space<vmem>>, vector<1x8x32xf32>,
    return
  }
  func.func @transform_0(%arg0: i32, %arg1: i32) -> (i32, i32, i32) {
    %c0_i32 = arith.constant 0 : i32
    %c0_i32_0 = arith.constant 0 : i32
    %c0_i32_1 = arith.constant 0 : i32
    return %arg0, %c0_i32, %c0_i32_0 : i32, i32, i32
  }
  func.func @transform_1(%arg0: i32, %arg1: i32) -> (i32, i32, i32) {
    %c0_i32 = arith.constant 0 : i32
    %c0_i32_0 = arith.constant 0 : i32
    %c0_i32_1 = arith.constant 0 : i32
    return %arg0, %c0_i32, %c0_i32_0 : i32, i32, i32
  }
  func.func @transform_2(%arg0: i32, %arg1: i32) -> (i32, i32, i32) {
    %c0_i32 = arith.constant 0 : i32
    %c0_i32_0 = arith.constant 0 : i32
    %c0_i32_1 = arith.constant 0 : i32
    return %arg0, %c0_i32, %c0_i32_0 : i32, i32, i32
  }
  func.func @transform_3(%arg0: i32, %arg1: i32) -> (i32, i32, i32) {
    %c0_i32 = arith.constant 0 : i32
    %c0_i32_0 = arith.constant 0 : i32
    %c0_i32_1 = arith.constant 0 : i32
    return %arg0, %c0_i32, %c0_i32_0 : i32, i32, i32
  }
  func.func @transform_4(%arg0: i32, %arg1: i32) -> (i32, i32, i32) {
    %c0_i32 = arith.constant 0 : i32
    %c0_i32_0 = arith.constant 0 : i32
    %c0_i32_1 = arith.constant 0 : i32
    return %arg1, %c0_i32, %c0_i32_0 : i32, i32, i32
  }
  func.func @transform_5(%arg0: i32, %arg1: i32) -> (i32, i32, i32) {
    %c0_i32 = arith.constant 0 : i32
    %c0_i32_0 = arith.constant 0 : i32
    %c0_i32_1 = arith.constant 0 : i32
    return %arg1, %c0_i32, %c0_i32_0 : i32, i32, i32
  }
  func.func @transform_6(%arg0: i32, %arg1: i32) -> (i32, i32, i32) {
    %c0_i32 = arith.constant 0 : i32
    %c0_i32_0 = arith.constant 0 : i32
    %c0_i32_1 = arith.constant 0 : i32
    return %arg1, %c0_i32, %c0_i32_0 : i32, i32, i32
  }
  func.func @transform_7(%arg0: i32, %arg1: i32) -> (i32, i32, i32) {
    %c0_i32 = arith.constant 0 : i32
    %c0_i32_0 = arith.constant 0 : i32
    %c0_i32_1 = arith.constant 0 : i32
    return %arg1, %c0_i32, %c0_i32_0 : i32, i32, i32
  }
  func.func @transform_8(%arg0: i32, %arg1: i32) -> (i32, i32, i32) {
    %c0_i32 = arith.constant 0 : i32
    %c0_i32_0 = arith.constant 0 : i32
    %c0_i32_1 = arith.constant 0 : i32
    return %arg1, %c0_i32, %c0_i32_0 : i32, i32, i32
  }
  func.func @transform_9(%arg0: i32, %arg1: i32) -> (i32, i32, i32) {
    %c0_i32 = arith.constant 0 : i32
    %c0_i32_0 = arith.constant 0 : i32
    %c0_i32_1 = arith.constant 0 : i32
    return %arg1, %c0_i32, %c0_i32_0 : i32, i32, i32
  }
  func.func @transform_10(%arg0: i32, %arg1: i32) -> (i32, i32, i32) {
    %c0_i32 = arith.constant 0 : i32
    %c0_i32_0 = arith.constant 0 : i32
    %c0_i32_1 = arith.constant 0 : i32
    return %arg1, %c0_i32, %c0_i32_0 : i32, i32, i32
  }
  func.func @transform_11(%arg0: i32, %arg1: i32) -> (i32, i32, i32) {
    %c0_i32 = arith.constant 0 : i32
    %c0_i32_0 = arith.constant 0 : i32
    %c0_i32_1 = arith.constant 0 : i32
    return %arg1, %c0_i32, %c0_i32_0 : i32, i32, i32
  }
  func.func @transform_12(%arg0: i32, %arg1: i32) -> (i32, i32, i32) {
    %c0_i32 = arith.constant 0 : i32
    %c0_i32_0 = arith.constant 0 : i32
    %c0_i32_1 = arith.constant 0 : i32
    return %arg1, %c0_i32, %c0_i32_0 : i32, i32, i32
  }
  func.func @transform_13(%arg0: i32, %arg1: i32) -> (i32, i32, i32) {
    %c0_i32 = arith.constant 0 : i32
    %c0_i32_0 = arith.constant 0 : i32
    %c0_i32_1 = arith.constant 0 : i32
    return %arg1, %c0_i32, %c0_i32_0 : i32, i32, i32
  }
  func.func @transform_14(%arg0: i32, %arg1: i32) -> (i32, i32, i32) {
    %c0_i32 = arith.constant 0 : i32
    %c0_i32_0 = arith.constant 0 : i32
    %c0_i32_1 = arith.constant 0 : i32
    return %arg1, %c0_i32, %c0_i32_0 : i32, i32, i32
  }
  func.func @transform_15(%arg0: i32, %arg1: i32) -> (i32, i32, i32) {
    %c0_i32 = arith.constant 0 : i32
    %c0_i32_0 = arith.constant 0 : i32
    %c0_i32_1 = arith.constant 0 : i32
    return %arg1, %c0_i32, %c0_i32_0 : i32, i32, i32
  }
  func.func @transform_16(%arg0: i32, %arg1: i32) -> (i32, i32, i32) {
    %c0_i32 = arith.constant 0 : i32
    %c0_i32_0 = arith.constant 0 : i32
    %c0_i32_1 = arith.constant 0 : i32
    return %arg1, %c0_i32, %c0_i32_0 : i32, i32, i32
  }
  func.func @transform_17(%arg0: i32, %arg1: i32) -> (i32, i32, i32) {
    %c0_i32 = arith.constant 0 : i32
    %c0_i32_0 = arith.constant 0 : i32
    %c0_i32_1 = arith.constant 0 : i32
    return %arg1, %c0_i32, %c0_i32_0 : i32, i32, i32
  }
  func.func @transform_18(%arg0: i32, %arg1: i32) -> (i32, i32, i32) {
    %c0_i32 = arith.constant 0 : i32
    %c0_i32_0 = arith.constant 0 : i32
    %c0_i32_1 = arith.constant 0 : i32
    return %arg1, %c0_i32, %c0_i32_0 : i32, i32, i32
  }
  func.func @transform_19(%arg0: i32, %arg1: i32) -> (i32, i32, i32) {
    %c0_i32 = arith.constant 0 : i32
    %c0_i32_0 = arith.constant 0 : i32
    %c0_i32_1 = arith.constant 0 : i32
    return %arg1, %c0_i32, %c0_i32_0 : i32, i32, i32
  }
  func.func @transform_20(%arg0: i32, %arg1: i32) -> (i32, i32, i32) {
    %c0_i32 = arith.constant 0 : i32
    %c0_i32_0 = arith.constant 0 : i32
    %c0_i32_1 = arith.constant 0 : i32
    return %arg1, %c0_i32, %c0_i32_0 : i32, i32, i32
  }
  func.func @transform_21(%arg0: i32, %arg1: i32) -> (i32, i32, i32) {
    %c0_i32 = arith.constant 0 : i32
    %c0_i32_0 = arith.constant 0 : i32
    %c0_i32_1 = arith.constant 0 : i32
    return %arg1, %c0_i32, %c0_i32_0 : i32, i32, i32
  }
  func.func @transform_22(%arg0: i32, %arg1: i32) -> (i32, i32, i32) {
    %c0_i32 = arith.constant 0 : i32
    %c0_i32_0 = arith.constant 0 : i32
    %c0_i32_1 = arith.constant 0 : i32
    %c0_i32_2 = arith.constant 0 : i32
    return %c0_i32, %c0_i32_0, %c0_i32_1 : i32, i32, i32
  }
  func.func @transform_23(%arg0: i32, %arg1: i32) -> (i32, i32, i32) {
    %c0_i32 = arith.constant 0 : i32
    %c0_i32_0 = arith.constant 0 : i32
    %c0_i32_1 = arith.constant 0 : i32
    %c0_i32_2 = arith.constant 0 : i32
    return %c0_i32, %c0_i32_0, %c0_i32_1 : i32, i32, i32
  }
  func.func @transform_24(%arg0: i32, %arg1: i32) -> (i32, i32, i32) {
    %c0_i32 = arith.constant 0 : i32
    %c0_i32_0 = arith.constant 0 : i32
    %c0_i32_1 = arith.constant 0 : i32
    return %arg0, %c0_i32, %c0_i32_0 : i32, i32, i32
  }
}

</mosaic_0001>

<bundles_post_ra>
// kernel: transformer_decoder.1
= control target key start
LH: loop header
LB: loop body
LE: loop exit
PB: predicated region body
PF: predicated region fallthrough
CT: control target
= control target key end

     0   :  { %s3690_s26 = smov 0   ;;  %s3692_s27 = smov 0   ;;  %s4149_s0 = inlined_call_operand.vmem [shape: f32[2,8,32], index: 0, kind: input, shape index: {}]   ;;  %s4150_s1 = inlined_call_operand.vmem [shape: bf16[2,16,32], index: 1, kind: input, shape index: {}]   ;;  %s4151_s2 = inlined_call_operand.vmem [shape: bf16[2,16,32], index: 2, kind: input, shape index: {}]   ;;  %s4152_s3 = inlined_call_operand.vmem [shape: f32[2,8,32], index: 3, kind: input, shape index: {}]   ;;  %s4153_s4 = inlined_call_operand.vmem [shape: bf16[2,32,96], index: 4, kind: input, shape index: {}]   ;;  %s4154_s5 = inlined_call_operand.vmem [shape: f32[2,1,96], index: 5, kind: input, shape index: {}]   ;;  %s4155_s6 = inlined_call_operand.vmem [shape: bf16[2,32,32], index: 6, kind: input, shape index: {}]   ;;  %s4156_s7 = inlined_call_operand.vmem [shape: f32[2,1,32], index: 7, kind: input, shape index: {}]   ;;  %s4157_s8 = inlined_call_operand.vmem [shape: bf16[2,32,96], index: 8, kind: input, shape index: {}]   ;;  %s4158_s9 = inlined_call_operand.vmem [shape: f32[2,1,96], index: 9, kind: input, shape index: {}]   ;;  %s4159_s10 = inlined_call_operand.vmem [shape: bf16[2,32,32], index: 10, kind: input, shape index: {}]   ;;  %s4160_s11 = inlined_call_operand.vmem [shape: f32[2,1,32], index: 11, kind: input, shape index: {}]   ;;  %s4161_s12 = inlined_call_operand.vmem [shape: bf16[2,32,64], index: 12, kind: input, shape index: {}]   ;;  %s4162_s13 = inlined_call_operand.vmem [shape: f32[2,1,64], index: 13, kind: input, shape index: {}]   ;;  %s4163_s14 = inlined_call_operand.vmem [shape: bf16[2,64,32], index: 14, kind: input, shape index: {}]   ;;  %s4164_s15 = inlined_call_operand.vmem [shape: f32[2,1,32], index: 15, kind: input, shape index: {}]   ;;  %s4165_s16 = inlined_call_operand.vmem [shape: f32[2,1,32], index: 16, kind: input, shape index: {}]   ;;  %s4166_s17 = inlined_call_operand.vmem [shape: f32[2,1,32], index: 17, kind: input, shape index: {}]   ;;  %s4167_s18 = inlined_call_operand.vmem [shape: f32[2,1,32], index: 18, kind: input, shape index: {}]   ;;  %s4168_s19 = inlined_call_operand.vmem [shape: f32[2,1,32], index: 19, kind: input, shape index: {}]   ;;  %s4169_s20 = inlined_call_operand.vmem [shape: f32[2,1,32], index: 20, kind: input, shape index: {}]   ;;  %s4170_s21 = inlined_call_operand.vmem [shape: f32[2,1,32], index: 21, kind: input, shape index: {}]   ;;  %s4171_s22 = inlined_call_operand.vmem [shape: f32[1,1,32], index: 22, kind: input, shape index: {}]   ;;  %s4172_s23 = inlined_call_operand.vmem [shape: f32[1,1,32], index: 23, kind: input, shape index: {}]   ;;  %s4173_s24 = inlined_call_operand.vmem [shape: f32[2,8,32], index: 24, kind: output, shape index: {}]  }
   0x1   :  { %4181 = sst [smem:[#allocation12_spill]] %s4149_s0  ;;  %s3694_s28 = smov 0  }
   0x2   :  { %4182 = sst [smem:[#allocation13_spill]] %s4150_s1 }
   0x3   :  { %4183 = sst [smem:[#allocation14_spill]] %s4151_s2 }
   0x4   :  { %4184 = sst [smem:[#allocation15_spill]] %s4152_s3 }
   0x5   :  { %4185 = sst [smem:[#allocation16_spill]] %s4153_s4 }
   0x6   :  { %4186 = sst [smem:[#allocation17_spill]] %s4154_s5  ;;  %s3688_s5 = smov 0  }
   0x7   :  { %4187 = sst [smem:[#allocation18_spill]] %s4155_s6  ;;  %s3696_s6 = smov 0  }
   0x8   :  { %4188 = sst [smem:[#allocation19_spill]] %s4156_s7 }
   0x9   :  { %4189 = sst [smem:[#allocation20_spill]] %s4157_s8 }
   0xa   :  { %4190 = sst [smem:[#allocation21_spill]] %s4159_s10 }
   0xb   :  { %4191 = sst [smem:[#allocation22_spill]] %s4161_s12 }
   0xc   :  { %4192 = sst [smem:[#allocation23_spill]] %s4162_s13 }
   0xd   :  { %4193 = sst [smem:[#allocation24_spill]] %s4163_s14 }
   0xe   :  { %4194 = sst [smem:[#allocation25_spill]] %s4164_s15 }
   0xf   :  { %4195 = sst [smem:[#allocation26_spill]] %s4168_s19 }
  0x10   :  { %4196 = sst [smem:[#allocation27_spill]] %s4169_s20 }
  0x11   :  { %4197 = sst [smem:[#allocation28_spill]] %s4170_s21 }
  0x12   :  { %4198 = sst [smem:[#allocation29_spill]] %s4171_s22 }
  0x13   :  { %4199 = sst [smem:[#allocation30_spill]] %s4172_s23 }
  0x14   :  { %4200 = sst [smem:[#allocation31_spill]] %s4173_s24 }
  0x15 LB: > { %4201 = sst [smem:[#allocation3_spill]] %s3535_s5  ;;  %s43_s2 = sadd.s32 1, %s3543_s27  ;;  %s3551_s6 = sphi %s3696_s6, %s34_s6   ;;  %s3547_s28 = sphi %s3694_s28, %s4260_s28   ;;  %s3543_s27 = sphi %s3692_s27, %s4259_s27   ;;  %s3539_s26 = sphi %s3690_s26, %s4258_s26   ;;  %s3535_s5 = sphi %s3688_s5, %s4257_s5  }
  0x16   : > { %4202 = sst [smem:[#allocation4_spill]] %s3543_s27  ;;  %s46_s29 = sadd.s32 1, %s3547_s28 }
  0x17   : > { %4203 = sst [smem:[#allocation5_spill]] %s3547_s28  ;;  %p44_p0 = scmp.ge.s32.totalorder %s43_s2, 2 }
  0x18   : > { %4204 = sst [smem:[#allocation6_spill]] %s3551_s6  ;;  %p3058_p1 = scmp.ge.s32.totalorder %s3551_s6, 1 }
  0x19   : > { %p858_p2 = scmp.lt.s32.totalorder %s3551_s6, 5  ;;  %s4262_s2 = smov (%p44_p0, %s43_s2), 0 }
  0x1a   : > { %4205 = sst [smem:[#allocation7_spill]] %s4262_s2  ;;  %s4264_s29 = smov (!%p44_p0, %s46_s29), %s3547_s28 }
  0x1b   : > { %p859_p3 = pnand %p3058_p1, %p858_p2  ;;  %p48_p4 = scmp.ge.s32.totalorder %s4264_s29, 2 }
  0x1d   : > { %s4266_s29 = smov (%p48_p4, %s4264_s29), 0  ;;  %862 = sbr.rel (%p859_p3) target bundleno = 4725 (0x1275), region = 116 }
  0x1e   : > { %4206 = sst [smem:[#allocation8_spill]] %s4266_s29 }
  0x24   : > { %p1002_p5 = scmp.lt.s32.totalorder %s3539_s26, 1  ;;  %p1020_p6 = scmp.lt.s32.totalorder %s3535_s5, 1 }
  0x25   : > { %s4207_s25 = sld [smem:[#allocation12_spill]]  ;;  %s4212_s29 = sld [smem:[#allocation16_spill]] }
  0x26   : > { %s4268_s26 = smov (!%p1002_p5, %s3539_s26), 1  ;;  %s4213_s6 = sld [smem:[#allocation18_spill]] }
  0x27   : > { %s3722_s0 = scalar_select %p1020_p6, %s3535_s5, 1 }
  0x28   : > { %s3724_s7 = sshll.u32 %s4268_s26, 3  ;;  %s4216_s3 = sld [smem:[#allocation20_spill]] }
  0x29   : > { %s3138_s30 = sshll.u32 %s3722_s0, 4  ;;  %s4217_s10 = sld [smem:[#allocation21_spill]] }
  0x2a   : > { %s4218_s12 = sld [smem:[#allocation22_spill]]  ;;  %s3143_s19 = sshll.u32 %s3722_s0, 5 }
  0x2b   : > { %s1005_s8 = scalar_lea.vmem %s4207_s25, %s3724_s7  ;;  %s1024_s1 = scalar_lea.vmem %s4212_s29, %s3138_s30 }
  0x2c   : > { %s3753_s23 = scalar_lea.vmem %s4213_s6, %s3138_s30  ;;  %s4221_s14 = sld [smem:[#allocation24_spill]] }
  0x2d   : > { %4214 = sst [smem:[#allocation9_spill]] %s3753_s23  ;;  %s1076_s2 = scalar_lea.vmem %s4167_s18, %s3722_s0 }
  0x2e   : > { %s3762_s20 = scalar_lea.vmem %s4216_s3, %s3138_s30  ;;  %s4226_s22 = sld [smem:[#allocation28_spill]] }
  0x2f   : > { %s3771_s28 = scalar_lea.vmem %s4217_s10, %s3138_s30  ;;  %s4225_s10 = sld [smem:[#allocation27_spill]] }
  0x30   : > { %s3780_s24 = scalar_lea.vmem %s4218_s12, %s3138_s30  ;;  %s4227_s30 = sld [smem:[#allocation31_spill]] }
  0x31   : > { %4219 = sst [smem:[#allocation10_spill]] %s3780_s24  ;;  %s4228_s12 = sld [smem:[#allocation3_spill]] }
  0x32   : > { %s3790_s25 = scalar_lea.vmem %s4221_s14, %s3143_s19  ;;  %s4224_s19 = sld [smem:[#allocation26_spill]] }
  0x33   : > { %4222 = sst [smem:[#allocation11_spill]] %s3790_s25 }
  0x34   : > { %s1085_s6 = scalar_lea.vmem %s4226_s22, %s3722_s0 }
  0x35   : > { %s1082_s27 = scalar_lea.vmem %s4225_s10, %s3722_s0 }
  0x36   : > { %s1089_s26 = scalar_lea.vmem %s4227_s30, %s3724_s7 }
  0x37   : > { %p3078_p7 = scmp.ne.s32.totalorder %s4228_s12, 0 }
  0x38   : > { %s1079_s4 = scalar_lea.vmem %s4224_s19, %s3722_s0  ;;  %v1095_v0 = vld [vmem:[%s1005_s8] sm:$0xff] (!%p3078_p7)  ;;  %vm1096_vm0 = vcmask (!%p3078_p7), 261120  }
  0x39   : > { %1094 = sbr.rel (%p3078_p7) target bundleno = 64 (0x40), region = 120  ;;  %1097 = vst.msk [vmem:[#allocation2] sm:$0xff] (!%p3078_p7), %vm1096_vm0, %v1095_v0 }
  0x40 PF: > { %v3457_v1 = vld [vmem:[%s1024_s1] sm:$0xff]   ;;  %v3553_v2 = vmov 0.0   ;;  %v3458_v3 = vld [vmem:[%s1024_s1 + $0x8] sm:$0xff]   ;;  %vm3554_vm1 = vmmov 0   ;;  %s4229_s14 = sld [smem:[#allocation15_spill]]  ;;  %vm1125_vm2 = vcmask 261120   ;;  %s4236_s1 = scalar_lea.vmem %s4158_s9, %s3722_s0 }
  0x41   : > { %3205 = vmatprep.subr.bf16.mxu1 %v3553_v2  ;;  %3221 = vmatprep.subr.bf16.mxu0 %v3553_v2  ;;  %v3829_v4 = vld [vmem:[#allocation2] sm:$0xff]  ;;  %s4231_s24 = sld [smem:[#allocation17_spill]]  ;;  %s3555_s23 = smov 104   ;;  %vm1253_vm3 = vcmask 64512   ;;  %vm1498_vm4 = vcmask 1043456   ;;  %vm1693_vm5 = vcmask 130048  }
  0x42   : > { %3206 = vmatpush3.bf16.msra.mxu1 %v3457_v1  ;;  %3209 = vmatprep.mubr.msk.bf16.mxu1 %vm3554_vm1, %v3553_v2  ;;  %s3556_s5 = smov 120   ;;  %s3557_s21 = smov 64   ;;  %v1169_v24 = vpack.c.bf16 %v3829_v4, %v3829_v4  ;;  %vm1695_vm6 = vcmask 195584   ;;  %vm2669_vm7 = vcmask 523264  }
  0x43   : > { %3207 = vmatprep.subr.bf16.mxu1 %v3553_v2  ;;  %3223 = vmatprep.mubr.msk.bf16.mxu0 %vm3554_vm1, %v3553_v2  ;;  %s3558_s3 = smov 112   ;;  %s3559_s29 = smov 96  }
  0x44   : > { %s4233_s19 = sld [smem:[#allocation9_spill]]  ;;  %s3560_s10 = smov 8  }
  0x45   : > { %s3561_s22 = smov 16   ;;  %s3562_s30 = smov 24  }
  0x46   : > { %s4230_s15 = scalar_lea.vmem %s4229_s14, %s3724_s7  ;;  %3208 = vmatpush3.bf16.msra.mxu1 %v3458_v3  ;;  %s4234_s14 = sld [smem:[#allocation19_spill]] }
  0x47   : > { %v3836_v5 = vld [vmem:[%s4230_s15] sm:$0xff]  ;;  %3213 = vmatprep.subr.bf16.mxu1 %v3553_v2  ;;  %s4232_s25 = scalar_lea.vmem %s4231_s24, %s3722_s0  ;;  %s4240_s8 = scalar_lea.vmem %s4166_s17, %s3722_s0 }
  0x48   : > { %v1105_v6 = vadd.f32 %v3836_v5, %v3829_v4  ;;  %v3852_v8 = vld [vmem:[%s4232_s25] ss:$0 sm:$0xff]  ;;  %s4241_s25 = sld [smem:[#allocation14_spill]] }
  0x4a   : > { %v1106_v7 = vpack.c.bf16 %v1105_v6, %v1105_v6 }
  0x4c   : > { %3210 = vmatmul.mubr.msk.bf16.vlgmr.msra.gmra.mrb[0].mxu1 %vm1125_vm2, %v1106_v7  ;;  %s4235_s15 = scalar_lea.vmem %s4234_s14, %s3722_s0  ;;  %s4239_s14 = scalar_lea.vmem %s4165_s16, %s3722_s0 }
  0x4d   : > { %3217 = vmatprep.mubr.msk.bf16.mxu1 %vm3554_vm1, %v3553_v2 }
 0x11f   : > { %v1163_v9 = vpop.f32.mrb[0].mxu1 }
 0x120   : > { %v1164_v10 = vadd.f32 %v3852_v8, %v1163_v9  ;;  %v3211_v11 = vpop.f32.mrb[1].mxu1 }
 0x121   : > { %v1166_v12 = vpop.f32.mrb[2].mxu1 }
 0x122   : > { %1229 = vrot.lane.b32.xlu1 %v1164_v10, %s3555_s23  ;;  %1223 = vrot.lane.b32.xlu0 %v1164_v10, %s3556_s5  ;;  %v3212_v13 = vpop.f32.mrb[3].mxu1  ;;  %v1232_v14 = vpack.c.bf16 %v1164_v10, %v1164_v10 }
 0x126   : > { %1170 = vrot.lane.b32.xlu1 %v3457_v1, %s3557_s21  ;;  %1226 = vrot.lane.b32.xlu0 %v1164_v10, %s3558_s3 }
 0x12a   : > { %1251 = vrot.lane.b32.xlu1 %v1232_v14, %s3559_s29  ;;  %1172 = vrot.lane.b32.xlu0 %v3458_v3, %s3557_s21 }
 0x194   : > { %v1230_v15 = vpop.permute.xlu1 %1229  ;;  %v1224_v16 = vpop.permute.xlu0 %1223 }
 0x195   : > { %v1233_v17 = vpack.c.bf16 %v1224_v16, %v1224_v16  ;;  %v1235_v20 = vpack.c.bf16 %v1230_v15, %v1230_v15 }
 0x197   : > { %1301 = vrot.lane.b32.xlu0 %v1233_v17, %s3559_s29 }
 0x198   : > { %v1171_v18 = vpop.permute.xlu1 %1170  ;;  %v1227_v19 = vpop.permute.xlu0 %1226 }
 0x199   : > { %v1234_v21 = vpack.c.bf16 %v1227_v19, %v1227_v19  ;;  %3214 = vmatpush3.bf16.msra.mxu1 %v1171_v18 }
 0x19a   : > { %3215 = vmatprep.subr.bf16.mxu1 %v3553_v2 }
 0x19b   : > { %1399 = vrot.lane.b32.xlu0 %v1235_v20, %s3559_s29  ;;  %1350 = vrot.lane.b32.xlu1 %v1234_v21, %s3559_s29 }
 0x19c   : > { %v1252_v22 = vpop.permute.xlu1 %1251  ;;  %v1173_v23 = vpop.permute.xlu0 %1172 }
 0x19d   : > { %v1258_v25 = vsel %vm1253_vm3, %v1252_v22, 0  ;;  %3216 = vmatpush3.bf16.msra.mxu1 %v1173_v23 }
 0x19e   : > { %3222 = vmatpush3.bf16.xpose.msra.mxu0 %v1258_v25  ;;  %3227 = vmatprep.subr.bf16.mxu1 %v3553_v2 }
 0x19f   : > { %3233 = vmatprep.subr.bf16.mxu0 %v3553_v2 }
 0x1a0   : > { %3218 = vmatmul.mubr.msk.bf16.vlgmr.msra.gmra.mrb[4].mxu1 %vm1125_vm2, %v1169_v24 }
 0x1a1   : > { %3229 = vmatprep.mubr.msk.bf16.mxu1 %vm3554_vm1, %v3553_v2 }
 0x1a5   : > { %3224 = vmatmul.mubr.msk.bf16.vlgmr.msra.gmra.mrb[0].mxu0 %vm1253_vm3, %v1232_v14 }
 0x1a6   : > { %3235 = vmatprep.mubr.msk.bf16.mxu0 %vm3554_vm1, %v3553_v2 }
 0x209   : > { %v1302_v26 = vpop.permute.xlu0 %1301 }
 0x20a   : > { %v1307_v27 = vsel %vm1253_vm3, %v1302_v26, 0 }
 0x20b   : > { %3228 = vmatpush3.bf16.xpose.msra.mxu1 %v1307_v27 }
 0x20c   : > { %3239 = vmatprep.subr.bf16.mxu1 %v3553_v2 }
 0x20d   : > { %v1351_v28 = vpop.permute.xlu1 %1350  ;;  %v1400_v30 = vpop.permute.xlu0 %1399 }
 0x20e   : > { %v1356_v29 = vsel %vm1253_vm3, %v1351_v28, 0  ;;  %v1405_v31 = vsel %vm1253_vm3, %v1400_v30, 0 }
 0x20f   : > { %3234 = vmatpush3.bf16.xpose.msra.mxu0 %v1356_v29 }
 0x210   : > { %3245 = vmatprep.subr.bf16.mxu0 %v3553_v2 }
 0x212   : > { %3230 = vmatmul.mubr.msk.bf16.vlgmr.msra.gmra.mrb[8].mxu1 %vm1253_vm3, %v1233_v17 }
 0x213   : > { %3240 = vmatpush3.bf16.xpose.msra.mxu1 %v1405_v31  ;;  %3241 = vmatprep.mubr.msk.bf16.mxu1 %vm3554_vm1, %v3553_v2 }
 0x214   : > { %3251 = vmatprep.subr.bf16.mxu1 %v3553_v2 }
 0x216   : > { %3236 = vmatmul.mubr.msk.bf16.vlgmr.msra.gmra.mrb[4].mxu0 %vm1253_vm3, %v1234_v21 }
 0x217   : > { %3247 = vmatprep.mubr.msk.bf16.mxu0 %vm3554_vm1, %v3553_v2 }
 0x21a   : > { %3242 = vmatmul.mubr.msk.bf16.vlgmr.msra.gmra.mrb[12].mxu1 %vm1253_vm3, %v1235_v20 }
 0x21b   : > { %3253 = vmatprep.mubr.msk.bf16.mxu1 %vm3554_vm1, %v3553_v2 }
 0x273   : > { %v1216_v32 = vpop.f32.mrb[4].mxu1 }
 0x274   : > { %v3219_v33 = vpop.f32.mrb[5].mxu1 }
 0x275   : > { %v1219_v34 = vpop.f32.mrb[6].mxu1 }
 0x276   : > { %v3220_v35 = vpop.f32.mrb[7].mxu1 }
 0x278   : > { %v1294_v36 = vpop.f32.mrb[0].mxu0 }
 0x279   : > { %v3225_v37 = vpop.f32.mrb[1].mxu0  ;;  %v1447_v38 = vsel %vm1253_vm3, %v1294_v36, -inf }
 0x27a   : > { %1448 = vmax.xlane.f32.xlu1 %v1447_v38  ;;  %v1297_v39 = vpop.f32.mrb[2].mxu0 }
 0x27b   : > { %v3226_v40 = vpop.f32.mrb[3].mxu0 }
 0x2e5   : > { %v1343_v41 = vpop.f32.mrb[8].mxu1 }
 0x2e6   : > { %v3231_v42 = vpop.f32.mrb[9].mxu1  ;;  %v1450_v43 = vsel %vm1253_vm3, %v1343_v41, -inf }
 0x2e7   : > { %1451 = vmax.xlane.f32.xlu0 %v1450_v43  ;;  %v1346_v44 = vpop.f32.mrb[10].mxu1 }
 0x2e8   : > { %v3232_v45 = vpop.f32.mrb[11].mxu1 }
 0x2e9   : > { %v1392_v46 = vpop.f32.mrb[4].mxu0 }
 0x2ea   : > { %v3237_v47 = vpop.f32.mrb[5].mxu0  ;;  %v1453_v48 = vsel %vm1253_vm3, %v1392_v46, -inf }
 0x2eb   : > { %v1395_v49 = vpop.f32.mrb[6].mxu0  ;;  %1454 = vmax.xlane.f32.xlu0 %v1453_v48  ;;  %v3459_v48 = vld [vmem:[%s4233_s19] sm:$0xff]  }
 0x2ec   : > { %v3238_v50 = vpop.f32.mrb[7].mxu0  ;;  %v3460_v49 = vld [vmem:[%s4233_s19 + $0x8] sm:$0xff]   ;;  %s4237_s19 = sld [smem:[#allocation13_spill]] }
 0x2ed   : > { %v1441_v51 = vpop.f32.mrb[12].mxu1 }
 0x2ee   : > { %v3243_v52 = vpop.f32.mrb[13].mxu1  ;;  %v1456_v53 = vsel %vm1253_vm3, %v1441_v51, -inf }
 0x2ef   : > { %1457 = vmax.xlane.f32.xlu1 %v1456_v53  ;;  %v1444_v54 = vpop.f32.mrb[14].mxu1 }
 0x2f0   : > { %v3244_v55 = vpop.f32.mrb[15].mxu1 }
 0x2f2   : > { %s4238_s12 = scalar_lea.vmem %s4237_s19, %s3724_s7  ;;  %s4242_s19 = scalar_lea.vmem %s4241_s25, %s3724_s7 }
 0x301   : > { %1176 = vrot.lane.b32.xlu0 %v3852_v8, %s3557_s21 }
 0x307   : > { %v1449_v56 = vpop.xlane.xlu1 %1448 }
 0x308   : > { %v1459_v57 = vsub.f32 %v1294_v36, %v1449_v56 }
 0x30a   : > { %v1463_v58 = vmul.f32 1.442695, %v1459_v57 }
 0x30c   : > { %3473 = vpow2.f32 %v1463_v58 }
 0x316   : > { %v3474_v59 = vpop.eup %3473 }
 0x317   : > { %v1471_v60 = vsel %vm1253_vm3, %v3474_v59, 0.0 }
 0x318   : > { %1472 = vadd.xlane.f32.xlu1 %v1471_v60 }
 0x374   : > { %v1452_v61 = vpop.xlane.xlu0 %1451 }
 0x375   : > { %v1460_v62 = vsub.f32 %v1343_v41, %v1452_v61 }
 0x377   : > { %v1465_v63 = vmul.f32 1.442695, %v1460_v62 }
 0x378   : > { %v1455_v0 = vpop.xlane.xlu0 %1454 }
 0x379   : > { %3475 = vpow2.f32 %v1465_v63  ;;  %v1461_v1 = vsub.f32 %v1392_v46, %v1455_v0 }
 0x37b   : > { %v1467_v3 = vmul.f32 1.442695, %v1461_v1 }
 0x37c   : > { %v1177_v6 = vpop.permute.xlu0 %1176  ;;  %v1458_v7 = vpop.xlane.xlu1 %1457 }
 0x37d   : > { %3477 = vpow2.f32 %v1467_v3  ;;  %v1217_v9 = vadd.f32 %v1216_v32, %v1177_v6  ;;  %v1462_v8 = vsub.f32 %v1441_v51, %v1458_v7 }
 0x37f   : > { %v1469_v10 = vmul.f32 1.442695, %v1462_v8  ;;  %1240 = vrot.lane.b32.xlu0 %v1217_v9, %s3558_s3  ;;  %v1246_v11 = vpack.c.bf16 %v1217_v9, %v1217_v9 }
 0x381   : > { %3479 = vpow2.f32 %v1469_v10  ;;  %v1500_v12 = vsel %vm1498_vm4, %v1246_v11, 0 }
 0x382   : > { %3246 = vmatpush3.bf16.msra.mxu0 %v1500_v12 }
 0x383   : > { %v3476_v13 = vpop.eup %3475  ;;  %1243 = vrot.lane.b32.xlu0 %v1217_v9, %s3555_s23  ;;  %3257 = vmatprep.subr.bf16.mxu0 %v3553_v2 }
 0x384   : > { %v1474_v14 = vsel %vm1253_vm3, %v3476_v13, 0.0 }
 0x385   : > { %1475 = vadd.xlane.f32.xlu1 %v1474_v14 }
 0x387   : > { %v3478_v15 = vpop.eup %3477 }
 0x388   : > { %v1477_v16 = vsel %vm1253_vm3, %v3478_v15, 0.0 }
 0x389   : > { %1478 = vadd.xlane.f32.xlu1 %v1477_v16  ;;  %v3461_v16 = vld [vmem:[%s3762_s20] sm:$0xff]  }
 0x38b   : > { %v3480_v17 = vpop.eup %3479 }
 0x38c   : > { %v1480_v18 = vsel %vm1253_vm3, %v3480_v17, 0.0 }
 0x38d   : > { %1481 = vadd.xlane.f32.xlu1 %v1480_v18 }
 0x39e   : > { %1237 = vrot.lane.b32.xlu1 %v1217_v9, %s3556_s5  ;;  %v3092_v9 = vld [vmem:[%s4235_s15] ss:$0 sm:$0xff] }
 0x3a5   : > { %v1473_v19 = vpop.xlane.xlu1 %1472 }
 0x3a6   : > { %3481 = vrcp.f32 %v1473_v19 }
 0x3b0   : > { %v3482_v20 = vpop.eup %3481 }
 0x3b1   : > { %v1487_v21 = vmul.f32 %v3482_v20, %v3474_v59 }
 0x3b3   : > { %v1491_v22 = vpack.c.bf16 %v1487_v21, %v1487_v21 }
 0x3b5   : > { %3248 = vmatmul.mubr.msk.bf16.vlgmr.msra.gmra.mrb[8].mxu0 %vm1253_vm3, %v1491_v22 }
 0x3b6   : > { %3259 = vmatprep.mubr.msk.bf16.mxu0 %vm3554_vm1, %v3553_v2 }
 0x3f1   : > { %v1241_v23 = vpop.permute.xlu0 %1240 }
 0x3f2   : > { %v1248_v24 = vpack.c.bf16 %v1241_v23, %v1241_v23  ;;  %v3958_v23 = vld [vmem:[%s4236_s1] ss:$0 sm:$0xff] }
 0x3f4   : > { %v1592_v25 = vsel %vm1498_vm4, %v1248_v24, 0 }
 0x3f5   : > { %3258 = vmatpush3.bf16.msra.mxu0 %v1592_v25  ;;  %v1244_v30 = vpop.permute.xlu0 %1243 }
 0x3f6   : > { %3269 = vmatprep.subr.bf16.mxu0 %v3553_v2  ;;  %v1249_v35 = vpack.c.bf16 %v1244_v30, %v1244_v30  ;;  %v3096_v30 = vld [vmem:[%s4239_s14] ss:$0 sm:$0xff]  ;;  %s4247_s14 = sld [smem:[#allocation23_spill]] }
 0x3f8   : > { %v1638_v41 = vsel %vm1498_vm4, %v1249_v35, 0 }
 0x3fc   : > { %s4248_s15 = scalar_lea.vmem %s4247_s14, %s3722_s0 }
 0x412   : > { %v1476_v26 = vpop.xlane.xlu1 %1475 }
 0x413   : > { %3483 = vrcp.f32 %v1476_v26 }
 0x416   : > { %v1479_v27 = vpop.xlane.xlu1 %1478 }
 0x417   : > { %3485 = vrcp.f32 %v1479_v27 }
 0x41a   : > { %v1482_v28 = vpop.xlane.xlu1 %1481 }
 0x41b   : > { %3487 = vrcp.f32 %v1482_v28  ;;  %v3463_v28 = vld [vmem:[%s4238_s12] sm:$0xff]  }
 0x41d   : > { %v3484_v29 = vpop.eup %3483 }
 0x41e   : > { %v1238_v31 = vpop.permute.xlu1 %1237  ;;  %v1488_v32 = vmul.f32 %v3484_v29, %v3476_v13 }
 0x41f   : > { %v1247_v33 = vpack.c.bf16 %v1238_v31, %v1238_v31 }
 0x420   : > { %v1492_v38 = vpack.c.bf16 %v1488_v32, %v1488_v32  ;;  %v3097_v32 = vld [vmem:[%s4240_s8] ss:$0 sm:$0xff]  ;;  %s4249_s8 = sld [smem:[#allocation25_spill]] }
 0x421   : > { %v3486_v34 = vpop.eup %3485  ;;  %v1546_v36 = vsel %vm1498_vm4, %v1247_v33, 0 }
 0x422   : > { %v1489_v37 = vmul.f32 %v3486_v34, %v3478_v15  ;;  %3252 = vmatpush3.bf16.msra.mxu1 %v1546_v36 }
 0x423   : > { %3263 = vmatprep.subr.bf16.mxu1 %v3553_v2 }
 0x424   : > { %v1493_v39 = vpack.c.bf16 %v1489_v37, %v1489_v37 }
 0x425   : > { %v3488_v40 = vpop.eup %3487  ;;  %3254 = vmatmul.mubr.msk.bf16.vlgmr.msra.gmra.mrb[16].mxu1 %vm1253_vm3, %v1492_v38 }
 0x426   : > { %3260 = vmatmul.mubr.msk.bf16.vlgmr.msra.gmra.mrb[12].mxu0 %vm1253_vm3, %v1493_v39  ;;  %3264 = vmatpush3.bf16.msra.mxu1 %v1638_v41  ;;  %v1490_v42 = vmul.f32 %v3488_v40, %v3480_v17  ;;  %v3462_v17 = vld [vmem:[%s3762_s20 + $0x8] sm:$0xff]   ;;  %s4250_s1 = scalar_lea.vmem %s4249_s8, %s3722_s0 }
 0x427   : > { %3265 = vmatprep.mubr.msk.bf16.mxu1 %vm3554_vm1, %v3553_v2  ;;  %3273 = vmatprep.mubr.msk.bf16.mxu0 %vm3554_vm1, %v3553_v2 }
 0x428   : > { %3277 = vmatprep.subr.bf16.mxu1 %v3553_v2  ;;  %v1494_v43 = vpack.c.bf16 %v1490_v42, %v1490_v42  ;;  %3270 = vmatpush3.bf16.msra.mxu0 %v3459_v48 }
 0x429   : > { %3271 = vmatprep.subr.bf16.mxu0 %v3553_v2 }
 0x42c   : > { %3272 = vmatpush3.bf16.msra.mxu0 %v3460_v49 }
 0x42d   : > { %3266 = vmatmul.mubr.msk.bf16.vlgmr.msra.gmra.mrb[20].mxu1 %vm1253_vm3, %v1494_v43  ;;  %3285 = vmatprep.subr.bf16.mxu0 %v3553_v2 }
 0x42e   : > { %3281 = vmatprep.mubr.msk.bf16.mxu1 %vm3554_vm1, %v3553_v2  ;;  %3278 = vmatpush3.bf16.msra.mxu1 %v3461_v16 }
 0x42f   : > { %3279 = vmatprep.subr.bf16.mxu1 %v3553_v2 }
 0x432   : > { %3280 = vmatpush3.bf16.msra.mxu1 %v3462_v17 }
 0x433   : > { %3293 = vmatprep.subr.bf16.mxu1 %v3553_v2 }
 0x488   : > { %v1536_v44 = vpop.f32.mrb[8].mxu0 }
 0x489   : > { %v3249_v45 = vpop.f32.mrb[9].mxu0 }
 0x48a   : > { %v1539_v46 = vpop.f32.mrb[10].mxu0 }
 0x48b   : > { %v3250_v47 = vpop.f32.mrb[11].mxu0 }
 0x4f8   : > { %v1582_v50 = vpop.f32.mrb[16].mxu1 }
 0x4f9   : > { %v1628_v51 = vpop.f32.mrb[12].mxu0  ;;  %1681 = vrot.lane.b32.xlu0 %v1582_v50, %s3560_s10  ;;  %v3255_v52 = vpop.f32.mrb[17].mxu1 }
 0x4fa   : > { %v1585_v53 = vpop.f32.mrb[18].mxu1  ;;  %v3261_v54 = vpop.f32.mrb[13].mxu0 }
 0x4fb   : > { %v3256_v55 = vpop.f32.mrb[19].mxu1  ;;  %v1631_v56 = vpop.f32.mrb[14].mxu0 }
 0x4fc   : > { %v3262_v57 = vpop.f32.mrb[15].mxu0 }
 0x4fd   : > { %1685 = vrot.lane.b32.xlu0 %v1628_v51, %s3561_s22 }
 0x500   : > { %v1674_v58 = vpop.f32.mrb[20].mxu1 }
 0x501   : > { %1689 = vrot.lane.b32.xlu1 %v1674_v58, %s3562_s30  ;;  %v3267_v59 = vpop.f32.mrb[21].mxu1 }
 0x502   : > { %v1677_v60 = vpop.f32.mrb[22].mxu1 }
 0x503   : > { %v3268_v61 = vpop.f32.mrb[23].mxu1 }
 0x56b   : > { %v1682_v62 = vpop.permute.xlu0 %1681 }
 0x56c   : > { %v1692_v0 = vsel %vm1253_vm3, %v1536_v44, %v1682_v62 }
 0x56f   : > { %v1686_v63 = vpop.permute.xlu0 %1685 }
 0x570   : > { %v1694_v1 = vsel %vm1693_vm5, %v1692_v0, %v1686_v63 }
 0x573   : > { %v1690_v3 = vpop.permute.xlu1 %1689 }
 0x574   : > { %v1696_v6 = vsel %vm1695_vm6, %v1694_v1, %v1690_v3 }
 0x575   : > { %v1697_v7 = vpack.c.bf16 %v1696_v6, %v1696_v6 }
 0x577   : > { %3274 = vmatmul.mubr.msk.bf16.vlgmr.msra.gmra.mrb[16].mxu0 %vm1125_vm2, %v1697_v7 }
 0x578   : > { %3289 = vmatprep.mubr.msk.bf16.mxu0 %vm3554_vm1, %v3553_v2 }
 0x64a   : > { %v1758_v8 = vpop.f32.mrb[16].mxu0 }
 0x64b   : > { %v1759_v10 = vadd.f32 %v3092_v9, %v1758_v8  ;;  %v3275_v11 = vpop.f32.mrb[17].mxu0 }
 0x64c   : > { %v1761_v12 = vpop.f32.mrb[18].mxu0 }
 0x64d   : > { %v3276_v13 = vpop.f32.mrb[19].mxu0  ;;  %v1764_v14 = vadd.f32 %v1759_v10, %v3829_v4 }
 0x64f   : > { %v1767_v15 = vsel %vm1125_vm2, %v1764_v14, 0.0 }
 0x650   : > { %1768 = vadd.xlane.f32.xlu0 %v1767_v15 }
 0x666   : > { %1870 = vrot.lane.b32.xlu0 %v3461_v16, %s3559_s29 }
 0x66a   : > { %1876 = vrot.lane.b32.xlu0 %v3958_v23, %s3559_s29 }
 0x66e   : > { %1932 = vrot.lane.b32.xlu0 %v3462_v17, %s3557_s21 }
 0x6dd   : > { %v1769_v18 = vpop.xlane.xlu0 %1768 }
 0x6de   : > { %v1771_v19 = vmul.f32 0.03125, %v1769_v18 }
 0x6e0   : > { %v1772_v20 = vsub.f32 %v1764_v14, %v1771_v19 }
 0x6e1   : > { %v1871_v22 = vpop.permute.xlu0 %1870 }
 0x6e2   : > { %v1773_v21 = vmul.f32 %v1772_v20, %v1772_v20  ;;  %3286 = vmatpush3.bf16.msra.mxu0 %v1871_v22 }
 0x6e3   : > { %3287 = vmatprep.subr.bf16.mxu0 %v3553_v2 }
 0x6e4   : > { %v1774_v4 = vsel %vm1125_vm2, %v1773_v21, 0.0 }
 0x6e5   : > { %1775 = vadd.xlane.f32.xlu1 %v1774_v4  ;;  %v1877_v37 = vpop.permute.xlu0 %1876 }
 0x6e9   : > { %v1933_v39 = vpop.permute.xlu0 %1932 }
 0x6f6   : > { %1872 = vrot.lane.b32.xlu1 %v3462_v17, %s3559_s29 }
 0x6fa   : > { %1930 = vrot.lane.b32.xlu1 %v3461_v16, %s3557_s21 }
 0x772   : > { %v1776_v24 = vpop.xlane.xlu1 %1775 }
 0x773   : > { %v1777_v25 = vmul.f32 0.03125, %v1776_v24 }
 0x775   : > { %v1778_v26 = vadd.f32 1e-05, %v1777_v25 }
 0x776   : > { %v1873_v27 = vpop.permute.xlu1 %1872 }
 0x777   : > { %3489 = vrsqrt.f32 %v1778_v26  ;;  %3288 = vmatpush3.bf16.msra.mxu0 %v1873_v27 }
 0x778   : > { %3301 = vmatprep.subr.bf16.mxu0 %v3553_v2 }
 0x77a   : > { %3290 = vmatmul.mubr.msk.bf16.vlgmr.msra.gmra.mrb[20].mxu0 %vm1125_vm2, %v3463_v28  ;;  %v1931_v38 = vpop.permute.xlu1 %1930 }
 0x77b   : > { %3303 = vmatprep.mubr.msk.bf16.mxu0 %vm3554_vm1, %v3553_v2 }
 0x781   : > { %v3490_v29 = vpop.eup %3489 }
 0x782   : > { %v1780_v31 = vmul.f32 %v3490_v29, %v1772_v20 }
 0x784   : > { %v1787_v33 = vmul.f32 %v3096_v30, %v1780_v31 }
 0x786   : > { %v3982_v34 = vadd.f32 %v3097_v32, %v1787_v33 }
 0x788   : > { %v1800_v35 = vadd.f32 %v3982_v34, %v3836_v5  ;;  %v3464_v5 = vld [vmem:[%s4242_s19] sm:$0xff]  }
 0x78a   : > { %v1801_v36 = vpack.c.bf16 %v1800_v35, %v1800_v35 }
 0x78c   : > { %3282 = vmatmul.mubr.msk.bf16.vlgmr.msra.gmra.mrb[24].mxu1 %vm1125_vm2, %v1801_v36 }
 0x78d   : > { %3297 = vmatprep.mubr.msk.bf16.mxu1 %vm3554_vm1, %v3553_v2  ;;  %3294 = vmatpush3.bf16.msra.mxu1 %v1931_v38 }
 0x78e   : > { %3295 = vmatprep.subr.bf16.mxu1 %v3553_v2 }
 0x791   : > { %3296 = vmatpush3.bf16.msra.mxu1 %v1933_v39 }
 0x792   : > { %3307 = vmatprep.subr.bf16.mxu1 %v3553_v2 }
 0x794   : > { %3298 = vmatmul.mubr.msk.bf16.vlgmr.msra.gmra.mrb[28].mxu1 %vm1125_vm2, %v3464_v5 }
 0x795   : > { %3309 = vmatprep.mubr.msk.bf16.mxu1 %vm3554_vm1, %v3553_v2 }
 0x84d   : > { %v1916_v40 = vpop.f32.mrb[20].mxu0 }
 0x84e   : > { %v3291_v41 = vpop.f32.mrb[21].mxu0  ;;  %v1917_v42 = vadd.f32 %v1916_v40, %v1877_v37 }
 0x84f   : > { %v1919_v43 = vpop.f32.mrb[22].mxu0 }
 0x850   : > { %v1920_v44 = vadd.f32 %v1919_v43, %v1877_v37  ;;  %v3292_v45 = vpop.f32.mrb[23].mxu0 }
 0x852   : > { %v3432_v46 = vpack.i.bf16 %v1920_v44, %v1917_v42  ;;  %v2017_v47 = vpack.c.bf16 %v1920_v44, %v1917_v42 }
 0x854   : > { %3433 = vrot.lane.b32.xlu0 %v3432_v46, %s3558_s3  ;;  %3428 = vrot.lane.b32.xlu1 %v3432_v46, %s3556_s5  ;;  %v2049_v48 = vsel %vm1253_vm3, %v2017_v47, 0 }
 0x855   : > { %3302 = vmatpush3.bf16.xpose.msra.mxu0 %v2049_v48 }
 0x856   : > { %3313 = vmatprep.subr.bf16.mxu0 %v3553_v2 }
 0x858   : > { %3438 = vrot.lane.b32.xlu0 %v3432_v46, %s3555_s23 }
 0x85f   : > { %v1857_v49 = vpop.f32.mrb[24].mxu1 }
 0x860   : > { %v1858_v50 = vadd.f32 %v3958_v23, %v1857_v49  ;;  %v3283_v51 = vpop.f32.mrb[25].mxu1 }
 0x861   : > { %v1860_v52 = vpop.f32.mrb[26].mxu1 }
 0x862   : > { %v1993_v53 = vpack.c.bf16 %v1858_v50, %v1858_v50  ;;  %1990 = vrot.lane.b32.xlu0 %v1858_v50, %s3555_s23  ;;  %1984 = vrot.lane.b32.xlu1 %v1858_v50, %s3556_s5  ;;  %v3284_v54 = vpop.f32.mrb[27].mxu1 }
 0x864   : > { %3304 = vmatmul.mubr.msk.bf16.vlgmr.msra.gmra.mrb[24].mxu0 %vm1253_vm3, %v1993_v53 }
 0x865   : > { %3315 = vmatprep.mubr.msk.bf16.mxu0 %vm3554_vm1, %v3553_v2 }
 0x866   : > { %1987 = vrot.lane.b32.xlu1 %v1858_v50, %s3558_s3 }
 0x867   : > { %v1976_v15 = vpop.f32.mrb[28].mxu1 }
 0x868   : > { %v3299_v16 = vpop.f32.mrb[29].mxu1 }
 0x869   : > { %v1979_v17 = vpop.f32.mrb[30].mxu1 }
 0x86a   : > { %v3300_v18 = vpop.f32.mrb[31].mxu1 }
 0x8c6   : > { %v3434_v55 = vpop.permute.xlu0 %3433  ;;  %v3429_v56 = vpop.permute.xlu1 %3428 }
 0x8c7   : > { %v3436_v57 = vunpack.i.h.bf16 %v3434_v55  ;;  %v3435_v58 = vunpack.i.l.bf16 %v3434_v55  ;;  %v3431_v59 = vunpack.i.h.bf16 %v3429_v56  ;;  %v3430_v60 = vunpack.i.l.bf16 %v3429_v56 }
 0x8c9   : > { %v2019_v61 = vpack.c.bf16 %v3436_v57, %v3435_v58  ;;  %v2018_v62 = vpack.c.bf16 %v3431_v59, %v3430_v60 }
 0x8ca   : > { %v3439_v1 = vpop.permute.xlu0 %3438 }
 0x8cb   : > { %v2095_v63 = vsel %vm1253_vm3, %v2018_v62, 0  ;;  %v2141_v0 = vsel %vm1253_vm3, %v2019_v61, 0  ;;  %v3441_v3 = vunpack.i.h.bf16 %v3439_v1  ;;  %v3440_v6 = vunpack.i.l.bf16 %v3439_v1 }
 0x8cc   : > { %3308 = vmatpush3.bf16.xpose.msra.mxu1 %v2095_v63  ;;  %3314 = vmatpush3.bf16.xpose.msra.mxu0 %v2141_v0 }
 0x8cd   : > { %3319 = vmatprep.subr.bf16.mxu1 %v3553_v2  ;;  %3325 = vmatprep.subr.bf16.mxu0 %v3553_v2  ;;  %v2020_v7 = vpack.c.bf16 %v3441_v3, %v3440_v6 }
 0x8cf   : > { %v2187_v10 = vsel %vm1253_vm3, %v2020_v7, 0 }
 0x8d4   : > { %v1985_v9 = vpop.permute.xlu1 %1984  ;;  %v1991_v13 = vpop.permute.xlu0 %1990 }
 0x8d5   : > { %v1994_v8 = vpack.c.bf16 %v1985_v9, %v1985_v9  ;;  %v1996_v14 = vpack.c.bf16 %v1991_v13, %v1991_v13 }
 0x8d7   : > { %3310 = vmatmul.mubr.msk.bf16.vlgmr.msra.gmra.mrb[32].mxu1 %vm1253_vm3, %v1994_v8 }
 0x8d8   : > { %3320 = vmatpush3.bf16.xpose.msra.mxu1 %v2187_v10  ;;  %v1988_v11 = vpop.permute.xlu1 %1987  ;;  %3321 = vmatprep.mubr.msk.bf16.mxu1 %vm3554_vm1, %v3553_v2 }
 0x8d9   : > { %v1995_v12 = vpack.c.bf16 %v1988_v11, %v1988_v11  ;;  %3331 = vmatprep.subr.bf16.mxu1 %v3553_v2 }
 0x8db   : > { %3316 = vmatmul.mubr.msk.bf16.vlgmr.msra.gmra.mrb[28].mxu0 %vm1253_vm3, %v1995_v12 }
 0x8dc   : > { %3327 = vmatprep.mubr.msk.bf16.mxu0 %vm3554_vm1, %v3553_v2 }
 0x8df   : > { %3322 = vmatmul.mubr.msk.bf16.vlgmr.msra.gmra.mrb[36].mxu1 %vm1253_vm3, %v1996_v14 }
 0x8e0   : > { %3333 = vmatprep.mubr.msk.bf16.mxu1 %vm3554_vm1, %v3553_v2 }
 0x937   : > { %v2085_v19 = vpop.f32.mrb[24].mxu0 }
 0x938   : > { %v3305_v20 = vpop.f32.mrb[25].mxu0  ;;  %v2229_v21 = vsel %vm1693_vm5, %v2085_v19, -inf }
 0x939   : > { %2230 = vmax.xlane.f32.xlu1 %v2229_v21  ;;  %v2088_v4 = vpop.f32.mrb[26].mxu0 }
 0x93a   : > { %v3306_v22 = vpop.f32.mrb[27].mxu0 }
 0x9aa   : > { %v2131_v24 = vpop.f32.mrb[32].mxu1 }
 0x9ab   : > { %v3311_v25 = vpop.f32.mrb[33].mxu1  ;;  %v2232_v26 = vsel %vm1693_vm5, %v2131_v24, -inf }
 0x9ac   : > { %2233 = vmax.xlane.f32.xlu0 %v2232_v26  ;;  %v2134_v27 = vpop.f32.mrb[34].mxu1 }
 0x9ad   : > { %v3312_v28 = vpop.f32.mrb[35].mxu1 }
 0x9ae   : > { %v2177_v29 = vpop.f32.mrb[28].mxu0 }
 0x9af   : > { %v3317_v30 = vpop.f32.mrb[29].mxu0  ;;  %v2235_v31 = vsel %vm1693_vm5, %v2177_v29, -inf }
 0x9b0   : > { %v2180_v32 = vpop.f32.mrb[30].mxu0  ;;  %2236 = vmax.xlane.f32.xlu0 %v2235_v31 }
 0x9b1   : > { %v3318_v33 = vpop.f32.mrb[31].mxu0 }
 0x9b2   : > { %v2223_v35 = vpop.f32.mrb[36].mxu1 }
 0x9b3   : > { %v3323_v36 = vpop.f32.mrb[37].mxu1  ;;  %v2238_v37 = vsel %vm1693_vm5, %v2223_v35, -inf }
 0x9b4   : > { %2239 = vmax.xlane.f32.xlu1 %v2238_v37  ;;  %v2226_v38 = vpop.f32.mrb[38].mxu1  ;;  %v3466_v36 = vld [vmem:[%s3771_s28 + $0x8] sm:$0xff]  }
 0x9b5   : > { %v3324_v39 = vpop.f32.mrb[39].mxu1 }
 0x9c6   : > { %v2231_v5 = vpop.xlane.xlu1 %2230  ;;  %1936 = vrot.lane.b32.xlu0 %v3958_v23, %s3557_s21  ;;  %s4244_s21 = sld [smem:[#allocation10_spill]] }
 0x9c7   : > { %v2241_v40 = vsub.f32 %v2085_v19, %v2231_v5 }
 0x9c9   : > { %v2245_v41 = vmul.f32 1.442695, %v2241_v40 }
 0x9cb   : > { %3491 = vpow2.f32 %v2245_v41 }
 0x9d5   : > { %v3492_v42 = vpop.eup %3491 }
 0x9d6   : > { %v2253_v43 = vsel %vm1693_vm5, %v3492_v42, 0.0 }
 0x9d7   : > { %2254 = vadd.xlane.f32.xlu1 %v2253_v43 }
 0xa39   : > { %v2234_v44 = vpop.xlane.xlu0 %2233 }
 0xa3a   : > { %v2242_v45 = vsub.f32 %v2131_v24, %v2234_v44 }
 0xa3c   : > { %v2247_v46 = vmul.f32 1.442695, %v2242_v45 }
 0xa3d   : > { %v2237_v47 = vpop.xlane.xlu0 %2236 }
 0xa3e   : > { %3493 = vpow2.f32 %v2247_v46  ;;  %v2243_v48 = vsub.f32 %v2177_v29, %v2237_v47 }
 0xa40   : > { %v2249_v49 = vmul.f32 1.442695, %v2243_v48 }
 0xa41   : > { %v1937_v50 = vpop.permute.xlu0 %1936  ;;  %v2240_v51 = vpop.xlane.xlu1 %2239 }
 0xa42   : > { %3495 = vpow2.f32 %v2249_v49  ;;  %v1977_v52 = vadd.f32 %v1976_v15, %v1937_v50  ;;  %v1980_v53 = vadd.f32 %v1979_v17, %v1937_v50  ;;  %v2244_v23 = vsub.f32 %v2223_v35, %v2240_v51  ;;  %v3465_v35 = vld [vmem:[%s3771_s28] sm:$0xff]  }
 0xa44   : > { %v2251_v54 = vmul.f32 1.442695, %v2244_v23  ;;  %v3447_v55 = vpack.i.bf16 %v1980_v53, %v1977_v52  ;;  %v2041_v56 = vpack.c.bf16 %v1980_v53, %v1977_v52 }
 0xa46   : > { %3497 = vpow2.f32 %v2251_v54  ;;  %3448 = vrot.lane.b32.xlu0 %v3447_v55, %s3558_s3  ;;  %3326 = vmatpush3.bf16.msra.mxu0 %v2041_v56  ;;  %s4245_s3 = sld [smem:[#allocation11_spill]] }
 0xa47   : > { %3337 = vmatprep.subr.bf16.mxu0 %v3553_v2 }
 0xa48   : > { %v3494_v57 = vpop.eup %3493 }
 0xa49   : > { %v2256_v58 = vsel %vm1693_vm5, %v3494_v57, 0.0 }
 0xa4a   : > { %3453 = vrot.lane.b32.xlu0 %v3447_v55, %s3555_s23  ;;  %2257 = vadd.xlane.f32.xlu1 %v2256_v58 }
 0xa4c   : > { %v3496_v59 = vpop.eup %3495 }
 0xa4d   : > { %v2259_v60 = vsel %vm1693_vm5, %v3496_v59, 0.0 }
 0xa4e   : > { %2260 = vadd.xlane.f32.xlu1 %v2259_v60 }
 0xa50   : > { %v3498_v61 = vpop.eup %3497 }
 0xa51   : > { %v2262_v62 = vsel %vm1693_vm5, %v3498_v61, 0.0 }
 0xa52   : > { %2263 = vadd.xlane.f32.xlu1 %v2262_v62 }
 0xa63   : > { %3443 = vrot.lane.b32.xlu1 %v3447_v55, %s3556_s5  ;;  %s4243_s5 = scalar_lea.vmem %s4160_s11, %s3722_s0 }
 0xa64   : > { %v2255_v63 = vpop.xlane.xlu1 %2254  ;;  %v3114_v54 = vld [vmem:[%s4243_s5] ss:$0 sm:$0xff] }
 0xa65   : > { %3499 = vrcp.f32 %v2255_v63 }
 0xa6f   : > { %v3500_v0 = vpop.eup %3499 }
 0xa70   : > { %v2269_v1 = vmul.f32 %v3500_v0, %v3492_v42 }
 0xa72   : > { %v2273_v3 = vpack.c.bf16 %v2269_v1, %v2269_v1 }
 0xa74   : > { %3328 = vmatmul.mubr.msk.bf16.vlgmr.msra.gmra.mrb[32].mxu0 %vm1693_vm5, %v2273_v3 }
 0xa75   : > { %3339 = vmatprep.mubr.msk.bf16.mxu0 %vm3554_vm1, %v3553_v2 }
 0xab8   : > { %v3449_v6 = vpop.permute.xlu0 %3448 }
 0xab9   : > { %v3451_v7 = vunpack.i.h.bf16 %v3449_v6  ;;  %v3450_v9 = vunpack.i.l.bf16 %v3449_v6  ;;  %v3467_v6 = vld [vmem:[%s4244_s21] sm:$0xff]  }
 0xabb   : > { %v2043_v8 = vpack.c.bf16 %v3451_v7, %v3450_v9  ;;  %v3468_v7 = vld [vmem:[%s4244_s21 + $0x8] sm:$0xff]  }
 0xabc   : > { %v3454_v14 = vpop.permute.xlu0 %3453  ;;  %v3470_v9 = vld [vmem:[%s4245_s3 + $0x8] sm:$0xff]  }
 0xabd   : > { %3338 = vmatpush3.bf16.msra.mxu0 %v2043_v8  ;;  %v3456_v20 = vunpack.i.h.bf16 %v3454_v14  ;;  %v3455_v21 = vunpack.i.l.bf16 %v3454_v14 }
 0xabe   : > { %3349 = vmatprep.subr.bf16.mxu0 %v3553_v2 }
 0xabf   : > { %v2044_v27 = vpack.c.bf16 %v3456_v20, %v3455_v21  ;;  %v3472_v20 = vld [vmem:[%s4245_s3 + $0x18] sm:$0xff]   ;;  %v3120_v21 = vld [vmem:[%s4248_s15] ss:$0 sm:$0xff] }
 0xad7   : > { %v2258_v10 = vpop.xlane.xlu1 %2257 }
 0xad8   : > { %3501 = vrcp.f32 %v2258_v10 }
 0xadb   : > { %v2261_v11 = vpop.xlane.xlu1 %2260 }
 0xadc   : > { %3503 = vrcp.f32 %v2261_v11 }
 0xadf   : > { %v2264_v12 = vpop.xlane.xlu1 %2263 }
 0xae0   : > { %3505 = vrcp.f32 %v2264_v12 }
 0xae2   : > { %v3502_v13 = vpop.eup %3501 }
 0xae3   : > { %v3444_v15 = vpop.permute.xlu1 %3443  ;;  %v2270_v18 = vmul.f32 %v3502_v13, %v3494_v57  ;;  %v3118_v13 = vld [vmem:[%s1076_s2] ss:$0 sm:$0xff] }
 0xae4   : > { %v3446_v16 = vunpack.i.h.bf16 %v3444_v15  ;;  %v3445_v17 = vunpack.i.l.bf16 %v3444_v15  ;;  %v3119_v15 = vld [vmem:[%s1079_s4] ss:$0 sm:$0xff] }
 0xae5   : > { %v2274_v24 = vpack.c.bf16 %v2270_v18, %v2270_v18 }
 0xae6   : > { %v3504_v19 = vpop.eup %3503  ;;  %v2042_v4 = vpack.c.bf16 %v3446_v16, %v3445_v17 }
 0xae7   : > { %v2271_v22 = vmul.f32 %v3504_v19, %v3496_v59  ;;  %v3471_v19 = vld [vmem:[%s4245_s3 + $0x10] sm:$0xff]  }
 0xae8   : > { %3332 = vmatpush3.bf16.msra.mxu1 %v2042_v4 }
 0xae9   : > { %v2275_v25 = vpack.c.bf16 %v2271_v22, %v2271_v22  ;;  %3343 = vmatprep.subr.bf16.mxu1 %v3553_v2 }
 0xaea   : > { %v3506_v26 = vpop.eup %3505 }
 0xaeb   : > { %3334 = vmatmul.mubr.msk.bf16.vlgmr.msra.gmra.mrb[40].mxu1 %vm1693_vm5, %v2274_v24  ;;  %3340 = vmatmul.mubr.msk.bf16.vlgmr.msra.gmra.mrb[36].mxu0 %vm1693_vm5, %v2275_v25  ;;  %v2272_v28 = vmul.f32 %v3506_v26, %v3498_v61 }
 0xaec   : > { %3344 = vmatpush3.bf16.msra.mxu1 %v2044_v27  ;;  %3345 = vmatprep.mubr.msk.bf16.mxu1 %vm3554_vm1, %v3553_v2 }
 0xaed   : > { %3353 = vmatprep.mubr.msk.bf16.mxu0 %vm3554_vm1, %v3553_v2  ;;  %3357 = vmatprep.subr.bf16.mxu1 %v3553_v2  ;;  %v2276_v29 = vpack.c.bf16 %v2272_v28, %v2272_v28 }
 0xaee   : > { %3350 = vmatpush3.bf16.msra.mxu0 %v3465_v35 }
 0xaef   : > { %3351 = vmatprep.subr.bf16.mxu0 %v3553_v2 }
 0xaf2   : > { %3352 = vmatpush3.bf16.msra.mxu0 %v3466_v36 }
 0xaf3   : > { %3346 = vmatmul.mubr.msk.bf16.vlgmr.msra.gmra.mrb[44].mxu1 %vm1693_vm5, %v2276_v29  ;;  %3365 = vmatprep.subr.bf16.mxu0 %v3553_v2 }
 0xaf4   : > { %3361 = vmatprep.mubr.msk.bf16.mxu1 %vm3554_vm1, %v3553_v2  ;;  %3358 = vmatpush3.bf16.msra.mxu1 %v3467_v6 }
 0xaf5   : > { %3359 = vmatprep.subr.bf16.mxu1 %v3553_v2 }
 0xaf8   : > { %3360 = vmatpush3.bf16.msra.mxu1 %v3468_v7 }
 0xb47   : > { %v2314_v30 = vpop.f32.mrb[32].mxu0 }
 0xb48   : > { %v3329_v31 = vpop.f32.mrb[33].mxu0 }
 0xb49   : > { %v2317_v32 = vpop.f32.mrb[34].mxu0 }
 0xb4a   : > { %v3330_v33 = vpop.f32.mrb[35].mxu0 }
 0xbbe   : > { %v2357_v37 = vpop.f32.mrb[40].mxu1  ;;  %v2400_v38 = vpop.f32.mrb[36].mxu0 }
 0xbbf   : > { %v3341_v39 = vpop.f32.mrb[37].mxu0  ;;  %2450 = vrot.lane.b32.xlu0 %v2357_v37, %s3560_s10  ;;  %v3335_v5 = vpop.f32.mrb[41].mxu1  ;;  %s4254_s10 = sld [smem:[#allocation30_spill]] }
 0xbc0   : > { %v2360_v40 = vpop.f32.mrb[42].mxu1  ;;  %v2403_v41 = vpop.f32.mrb[38].mxu0 }
 0xbc1   : > { %v3336_v42 = vpop.f32.mrb[43].mxu1  ;;  %v3342_v43 = vpop.f32.mrb[39].mxu0 }
 0xbc3   : > { %2454 = vrot.lane.b32.xlu0 %v2400_v38, %s3561_s22 }
 0xbc6   : > { %v2443_v44 = vpop.f32.mrb[44].mxu1 }
 0xbc7   : > { %2458 = vrot.lane.b32.xlu1 %v2443_v44, %s3562_s30  ;;  %v3347_v45 = vpop.f32.mrb[45].mxu1 }
 0xbc8   : > { %v2446_v46 = vpop.f32.mrb[46].mxu1  ;;  %v3130_v45 = vld [vmem:[%s1082_s27] ss:$0 sm:$0xff] }
 0xbc9   : > { %v3348_v47 = vpop.f32.mrb[47].mxu1 }
 0xbca   : > { %v3131_v47 = vld [vmem:[%s1085_s6] ss:$0 sm:$0xff]  ;;  %s4253_s6 = sld [smem:[#allocation29_spill]] }
 0xc31   : > { %v2451_v48 = vpop.permute.xlu0 %2450 }
 0xc32   : > { %v2461_v50 = vsel %vm1253_vm3, %v2314_v30, %v2451_v48 }
 0xc35   : > { %v2455_v49 = vpop.permute.xlu0 %2454 }
 0xc36   : > { %v2462_v51 = vsel %vm1693_vm5, %v2461_v50, %v2455_v49 }
 0xc39   : > { %v2459_v52 = vpop.permute.xlu1 %2458 }
 0xc3a   : > { %v2463_v53 = vsel %vm1695_vm6, %v2462_v51, %v2459_v52 }
 0xc3b   : > { %v2464_v23 = vpack.c.bf16 %v2463_v53, %v2463_v53 }
 0xc3d   : > { %3354 = vmatmul.mubr.msk.bf16.vlgmr.msra.gmra.mrb[40].mxu0 %vm1125_vm2, %v2464_v23 }
 0xc3e   : > { %3373 = vmatprep.mubr.msk.bf16.mxu0 %vm3554_vm1, %v3553_v2 }
 0xd10   : > { %v2525_v55 = vpop.f32.mrb[40].mxu0 }
 0xd11   : > { %v2526_v56 = vadd.f32 %v3114_v54, %v2525_v55  ;;  %v3355_v57 = vpop.f32.mrb[41].mxu0 }
 0xd12   : > { %v2528_v58 = vpop.f32.mrb[42].mxu0 }
 0xd13   : > { %v3356_v59 = vpop.f32.mrb[43].mxu0  ;;  %v2531_v60 = vadd.f32 %v2526_v56, %v3982_v34  ;;  %v3469_v34 = vld [vmem:[%s4245_s3] sm:$0xff]  }
 0xd14   : > { %3366 = vmatpush3.bf16.msra.mxu0 %v3469_v34  ;;  %v3132_v59 = vld [vmem:[%s4253_s6] ss:$0 sm:$0xff] }
 0xd15   : > { %v2534_v61 = vsel %vm1125_vm2, %v2531_v60, 0.0  ;;  %3367 = vmatprep.subr.bf16.mxu0 %v3553_v2 }
 0xd16   : > { %2535 = vadd.xlane.f32.xlu0 %v2534_v61  ;;  %v3133_v61 = vld [vmem:[%s4254_s10] ss:$0 sm:$0xff] }
 0xd18   : > { %3368 = vmatpush3.bf16.msra.mxu0 %v3470_v9 }
 0xd19   : > { %3369 = vmatprep.subr.bf16.mxu0 %v3553_v2 }
 0xd1c   : > { %3370 = vmatpush3.bf16.msra.mxu0 %v3471_v19 }
 0xd1d   : > { %3371 = vmatprep.subr.bf16.mxu0 %v3553_v2  ;;  %v3124_v2 = vld [vmem:[%s4250_s1] ss:$0 sm:$0xff] }
 0xd20   : > { %3372 = vmatpush3.bf16.msra.mxu0 %v3472_v20 }
 0xda3   : > { %v2536_v62 = vpop.xlane.xlu0 %2535 }
 0xda4   : > { %v2537_v63 = vmul.f32 0.03125, %v2536_v62 }
 0xda6   : > { %v2538_v0 = vsub.f32 %v2531_v60, %v2537_v63 }
 0xda8   : > { %v2539_v1 = vmul.f32 %v2538_v0, %v2538_v0 }
 0xdaa   : > { %v2540_v3 = vsel %vm1125_vm2, %v2539_v1, 0.0 }
 0xdab   : > { %2541 = vadd.xlane.f32.xlu1 %v2540_v3 }
 0xe38   : > { %v2542_v8 = vpop.xlane.xlu1 %2541 }
 0xe39   : > { %v2543_v10 = vmul.f32 0.03125, %v2542_v8 }
 0xe3b   : > { %v2544_v11 = vadd.f32 1e-05, %v2543_v10 }
 0xe3d   : > { %3507 = vrsqrt.f32 %v2544_v11 }
 0xe47   : > { %v3508_v12 = vpop.eup %3507 }
 0xe48   : > { %v2546_v14 = vmul.f32 %v3508_v12, %v2538_v0 }
 0xe4a   : > { %v2553_v16 = vmul.f32 %v3118_v13, %v2546_v14 }
 0xe4c   : > { %v2560_v17 = vadd.f32 %v3119_v15, %v2553_v16 }
 0xe4e   : > { %v2561_v18 = vpack.c.bf16 %v2560_v17, %v2560_v17 }
 0xe50   : > { %3362 = vmatmul.mubr.msk.bf16.vlgmr.msra.gmra.mrb[48].mxu1 %vm1125_vm2, %v2561_v18 }
 0xf23   : > { %v2622_v4 = vpop.f32.mrb[48].mxu1 }
 0xf24   : > { %v2623_v22 = vadd.f32 %v3120_v21, %v2622_v4  ;;  %v3363_v24 = vpop.f32.mrb[49].mxu1 }
 0xf25   : > { %v2625_v25 = vpop.f32.mrb[50].mxu1 }
 0xf26   : > { %v2628_v26 = vmax.f32 %v2623_v22, 0.0  ;;  %v3364_v27 = vpop.f32.mrb[51].mxu1 }
 0xf28   : > { %v2629_v28 = vpack.c.bf16 %v2628_v26, %v2628_v26 }
 0xf2a   : > { %3374 = vmatmul.mubr.msk.bf16.vlgmr.msra.gmra.mrb[44].mxu0 %vm2669_vm7, %v2629_v28 }
 0xffd   : > { %v2707_v29 = vpop.f32.mrb[44].mxu0 }
 0xffe   : > { %v2708_v30 = vadd.f32 %v3124_v2, %v2707_v29  ;;  %v3375_v31 = vpop.f32.mrb[45].mxu0 }
 0xfff   : > { %v2710_v32 = vpop.f32.mrb[46].mxu0 }
0x1000   : > { %v3376_v33 = vpop.f32.mrb[47].mxu0  ;;  %v2713_v35 = vadd.f32 %v2708_v30, %v2560_v17 }
0x1002   : > { %v2716_v36 = vsel %vm1125_vm2, %v2713_v35, 0.0 }
0x1003   : > { %2717 = vadd.xlane.f32.xlu0 %v2716_v36 }
0x1090   : > { %v2718_v37 = vpop.xlane.xlu0 %2717 }
0x1091   : > { %v2719_v38 = vmul.f32 0.03125, %v2718_v37 }
0x1093   : > { %v2720_v39 = vsub.f32 %v2713_v35, %v2719_v38 }
0x1095   : > { %v2721_v5 = vmul.f32 %v2720_v39, %v2720_v39 }
0x1097   : > { %v2722_v40 = vsel %vm1125_vm2, %v2721_v5, 0.0 }
0x1098   : > { %2723 = vadd.xlane.f32.xlu0 %v2722_v40 }
0x1125   : > { %v2724_v41 = vpop.xlane.xlu0 %2723 }
0x1126   : > { %v2725_v42 = vmul.f32 0.03125, %v2724_v41 }
0x1128   : > { %v2726_v43 = vadd.f32 1e-05, %v2725_v42 }
0x112a   : > { %3509 = vrsqrt.f32 %v2726_v43 }
0x1134   : > { %v3510_v44 = vpop.eup %3509 }
0x1135   : > { %v2728_v46 = vmul.f32 %v3510_v44, %v2720_v39 }
0x1137   : > { %v2735_v48 = vmul.f32 %v3130_v45, %v2728_v46 }
0x1139   : > { %v2742_v49 = vadd.f32 %v3131_v47, %v2735_v48 }
0x113b   : > { %v2746_v50 = vsel %vm1125_vm2, %v2742_v49, 0.0  ;;  %2743 = vst.msk [vmem:[#allocation2] sm:$0xff] %vm1125_vm2, %v2742_v49 }
0x113c   : > { %2747 = vadd.xlane.f32.xlu1 %v2746_v50 }
0x11c9   : > { %v2748_v51 = vpop.xlane.xlu1 %2747 }
0x11ca   : > { %v2749_v52 = vmul.f32 0.03125, %v2748_v51 }
0x11cc   : > { %v2750_v53 = vsub.f32 %v2742_v49, %v2749_v52 }
0x11ce   : > { %v2751_v23 = vmul.f32 %v2750_v53, %v2750_v53 }
0x11d0   : > { %v2752_v54 = vsel %vm1125_vm2, %v2751_v23, 0.0 }
0x11d1   : > { %2753 = vadd.xlane.f32.xlu0 %v2752_v54 }
0x125e   : > { %v2754_v55 = vpop.xlane.xlu0 %2753 }
0x125f   : > { %v2755_v56 = vmul.f32 0.03125, %v2754_v55 }
0x1261   : > { %v2756_v57 = vadd.f32 1e-05, %v2755_v56 }
0x1263   : > { %3511 = vrsqrt.f32 %v2756_v57 }
0x126d   : > { %v3512_v58 = vpop.eup %3511 }
0x126e   : > { %v2758_v60 = vmul.f32 %v3512_v58, %v2750_v53 }
0x1270   : > { %v2765_v62 = vmul.f32 %v3132_v59, %v2758_v60 }
0x1272   : > { %v2772_v63 = vadd.f32 %v3133_v61, %v2765_v62 }
0x1274   : > { %2773 = vst.msk [vmem:[%s1089_s26] sm:$0xff] %vm1125_vm2, %v2772_v63 }
0x1275 PF: > { %s4256_s29 = sld [smem:[#allocation6_spill]]  ;;  %s4257_s5 = sld [smem:[#allocation4_spill]] }
0x1276   : > { %s4258_s26 = sld [smem:[#allocation5_spill]]  ;;  %s4259_s27 = sld [smem:[#allocation7_spill]] }
0x1277   : > { %s4260_s28 = sld [smem:[#allocation8_spill]] }
0x127b   : > { %s34_s6 = sadd.s32 1, %s4256_s29  }
0x127c   : > { %p31_p8 = scmp.ge.s32.totalorder %s34_s6, 6  }
0x127e   :  { %33 = sbr.rel (!%p31_p8) target bundleno = 21 (0x15), region = 213 }

</bundles_post_ra>
